<compile_context>
chip_gen: v6e
topology: v6e:2x2x1
jax: 0.10.0
libtpu: 0.0.40
codegen_flags: <defaults>
</compile_context>

<pallas_src>
import jax
import jax.numpy as jnp
from jax.experimental import pallas as pl
from jax.experimental.pallas import tpu as pltpu


def _round_up(x, m):
    return ((x + m - 1) // m) * m


def _sa_fused_kernel(xyz_ref, feat_ref, w1x_ref, w1f_ref, b1_ref,
                     w2_ref, b2_ref, out_ref):
    """One (batch, point-tile) block: both grouper branches, fused.

    xyz_ref  : (1, nt, 3)        point coordinates (natural N-major layout)
    feat_ref : (1, nt, C)        point features    (natural N-major layout)
    w1x_ref  : (3, 2H)           layer-1 weight (xyz columns), branches stacked
    w1f_ref  : (C, 2H)           layer-1 weight (feature columns), stacked
    b1_ref   : (1, 2H)           layer-1 bias, both branches
    w2_ref   : (2*Cout, 2H)      layer-2 block-diagonal weight (a | b)
    b2_ref   : (2*Cout, 1)       layer-2 bias, both branches
    out_ref  : (1, Cout, nt)     summed branch outputs, channel-major (NCHW)
    """
    xyz = xyz_ref[0]      # (nt, 3)
    feat = feat_ref[0]    # (nt, C)

    # Layer 1 (1x1 conv == GEMM).  Splitting the contraction over xyz and
    # features replaces the channel concat; both branches in one pass.
    h = jnp.dot(xyz, w1x_ref[...], preferred_element_type=jnp.float32)
    h = h + jnp.dot(feat, w1f_ref[...], preferred_element_type=jnp.float32)
    h = jnp.maximum(h + b1_ref[...], 0.0)                       # (nt, 2H)

    # Layer 2: single block-diagonal matmul in channel-major orientation so
    # the big point dimension lands on the lane axis (lane-dense stores).
    z = jnp.dot(w2_ref[...], h.T, preferred_element_type=jnp.float32)
    z = jnp.maximum(z + b2_ref[...], 0.0)                        # (2*Cout, nt)

    # all_features += new_features  (sum of the two groupers) -> single store.
    cout = out_ref.shape[1]
    out_ref[0] = z[:cout, :] + z[cout:, :]


def pointnet_sa_forward(xyz, features, params, *, point_tile=512):
    """xyz: (B, N, 3) float32, features: (B, N, C) float32.

    Returns (new_xyz, all_features) with new_xyz=None (npoint is None) and
    all_features of shape (B, Cout, 1, N)  (PyTorch NCHW SharedMLP output).
    """
    B, N, _ = xyz.shape
    C = features.shape[-1]
    H = params["w1a"].shape[0]
    Cout = params["w2a"].shape[0]

    # ---- pack / fuse the (tiny) weights once, outside the kernel ----------
    w1 = jnp.concatenate([params["w1a"], params["w1b"]], axis=0)       # (2H, 3+C)
    w1x_t = jnp.transpose(w1[:, :3]).astype(jnp.float32)               # (3, 2H)
    w1f_t = jnp.transpose(w1[:, 3:]).astype(jnp.float32)               # (C, 2H)
    b1 = jnp.concatenate([params["b1a"], params["b1b"]]).reshape(1, 2 * H)
    b1 = b1.astype(jnp.float32)
    zpad = jnp.zeros((Cout, H), jnp.float32)
    w2 = jnp.concatenate(
        [jnp.concatenate([params["w2a"], zpad], axis=1),
         jnp.concatenate([zpad, params["w2b"]], axis=1)], axis=0)      # (2Cout, 2H)
    w2 = w2.astype(jnp.float32)
    b2 = jnp.concatenate([params["b2a"], params["b2b"]]).reshape(2 * Cout, 1)
    b2 = b2.astype(jnp.float32)

    # ---- tile the point dimension (lane axis of the output) ---------------
    nt = min(point_tile, _round_up(N, 128))     # lane-dense tile, mult. of 128
    Np = _round_up(N, nt)
    xyz_p = xyz.astype(jnp.float32)
    feat_p = features.astype(jnp.float32)
    if Np != N:
        xyz_p = jnp.pad(xyz_p, ((0, 0), (0, Np - N), (0, 0)))
        feat_p = jnp.pad(feat_p, ((0, 0), (0, Np - N), (0, 0)))

    def rep(shape):
        zeros = (0,) * len(shape)
        return pl.BlockSpec(shape, lambda b, n: zeros)

    out = pl.pallas_call(
        _sa_fused_kernel,
        out_shape=jax.ShapeDtypeStruct((B, Cout, Np), jnp.float32),
        grid=(B, Np // nt),
        in_specs=[
            pl.BlockSpec((1, nt, 3), lambda b, n: (b, n, 0)),
            pl.BlockSpec((1, nt, C), lambda b, n: (b, n, 0)),
            rep((3, 2 * H)),
            rep((C, 2 * H)),
            rep((1, 2 * H)),
            rep((2 * Cout, 2 * H)),
            rep((2 * Cout, 1)),
        ],
        out_specs=pl.BlockSpec((1, Cout, nt), lambda b, n: (b, 0, n)),
        compiler_params=pltpu.CompilerParams(
            dimension_semantics=("parallel", "parallel")),
    )(xyz_p, feat_p, w1x_t, w1f_t, b1, w2, b2)

    if Np != N:
        out = out[:, :, :N]

    new_xyz = None  # npoint is None in the base module's __init__
    all_features = out[:, :, None, :]  # (B, Cout, 1, N), NCHW SharedMLP output
    # TODO(synk): furthest_point_sample / gather_operation path (npoint is not
    # None) not implemented; base-class defaults never reach it.
    return new_xyz, all_features


def _reference(xyz, features, params):
    """Pure-JAX reference of the same forward for a correctness check."""
    grouped = jnp.concatenate(
        [jnp.transpose(xyz, (0, 2, 1)), jnp.transpose(features, (0, 2, 1))],
        axis=1)

    def mlp(x, w1, b1, w2, b2):
        h = jnp.maximum(jnp.einsum("hc,bcn->bhn", w1, x) + b1[None, :, None], 0.0)
        return jnp.maximum(jnp.einsum("oh,bhn->bon", w2, h) + b2[None, :, None], 0.0)

    ya = mlp(grouped, params["w1a"], params["b1a"], params["w2a"], params["b2a"])
    yb = mlp(grouped, params["w1b"], params["b1b"], params["w2b"], params["b2b"])
    return (ya + yb)[:, :, None, :]


if __name__ == "__main__":
    B, N, C = 2, 1024, 4        # batch, points, extra feature channels
    Cin, Hdim, Cout = 3 + C, 32, 16

    key = jax.random.PRNGKey(0)
    ks = jax.random.split(key, 10)

    xyz = jax.random.normal(ks[0], (B, N, 3), dtype=jnp.float32)
    features = jax.random.normal(ks[1], (B, N, C), dtype=jnp.float32)

    params = {
        "w1a": 0.2 * jax.random.normal(ks[2], (Hdim, Cin), dtype=jnp.float32),
        "b1a": 0.1 * jax.random.normal(ks[3], (Hdim,), dtype=jnp.float32),
        "w2a": 0.2 * jax.random.normal(ks[4], (Cout, Hdim), dtype=jnp.float32),
        "b2a": 0.1 * jax.random.normal(ks[5], (Cout,), dtype=jnp.float32),
        "w1b": 0.2 * jax.random.normal(ks[6], (Hdim, Cin), dtype=jnp.float32),
        "b1b": 0.1 * jax.random.normal(ks[7], (Hdim,), dtype=jnp.float32),
        "w2b": 0.2 * jax.random.normal(ks[8], (Cout, Hdim), dtype=jnp.float32),
        "b2b": 0.1 * jax.random.normal(ks[9], (Cout,), dtype=jnp.float32),
    }

    new_xyz, all_features = pointnet_sa_forward(xyz, features, params)
    all_features = jax.block_until_ready(all_features)

    ref = _reference(xyz, features, params)
    assert new_xyz is None
    assert all_features.shape == (B, Cout, 1, N)
    assert jnp.allclose(all_features, ref, atol=1e-4, rtol=1e-4)

    print("KERNEL_OK")
</pallas_src>

<mosaic_0001>
module attributes {stable_mosaic.version = 11 : i64} {
  func.func @_sa_fused_kernel(%arg0: i32, %arg1: i32, %arg2: memref<1x512x3xf32, #tpu.memory_space<vmem>>, %arg3: memref<1x512x4xf32, #tpu.memory_space<vmem>>, %arg4: memref<3x64xf32, #tpu.memory_space<vmem>>, %arg5: memref<4x64xf32, #tpu.memory_space<vmem>>, %arg6: memref<1x64xf32, #tpu.memory_space<vmem>>, %arg7: memref<32x64xf32, #tpu.memory_space<vmem>>, %arg8: memref<32x1xf32, #tpu.memory_space<vmem>>, %arg9: memref<1x16x512xf32, #tpu.memory_space<vmem>>) attributes {dimension_semantics = [#tpu.dimension_semantics<parallel>, #tpu.dimension_semantics<parallel>], iteration_bounds = array<i64: 2, 2>, scalar_prefetch = 0 : i64, scratch_operands = 0 : i64, tpu.core_type = #tpu.core_type<tc>, window_params = [{transform_indices = @transform_0, window_bounds = array<i64: 1, 512, 3>}, {transform_indices = @transform_1, window_bounds = array<i64: 1, 512, 4>}, {pipeline_mode = #tpu.pipeline_mode<synchronous>, transform_indices = @transform_2, window_bounds = array<i64: 3, 64>}, {pipeline_mode = #tpu.pipeline_mode<synchronous>, transform_indices = @transform_3, window_bounds = array<i64: 4, 64>}, {pipeline_mode = #tpu.pipeline_mode<synchronous>, transform_indices = @transform_4, window_bounds = array<i64: 1, 64>}, {pipeline_mode = #tpu.pipeline_mode<synchronous>, transform_indices = @transform_5, window_bounds = array<i64: 32, 64>}, {pipeline_mode = #tpu.pipeline_mode<synchronous>, transform_indices = @transform_6, window_bounds = array<i64: 32, 1>}, {transform_indices = @transform_7, window_bounds = array<i64: 1, 16, 512>}]} {
    %c0 = arith.constant 0 : index
    %c0_0 = arith.constant 0 : index
    %c0_1 = arith.constant 0 : index
    %0 = vector.load %arg2[%c0, %c0_0, %c0_1] : memref<1x512x3xf32, #tpu.memory_space<vmem>>, vector<1x512x3xf32>
    %1 = vector.shape_cast %0 : vector<1x512x3xf32> to vector<512x3xf32>
    %c0_2 = arith.constant 0 : index
    %c0_3 = arith.constant 0 : index
    %c0_4 = arith.constant 0 : index
    %2 = vector.load %arg3[%c0_2, %c0_3, %c0_4] : memref<1x512x4xf32, #tpu.memory_space<vmem>>, vector<1x512x4xf32>
    %3 = vector.shape_cast %2 : vector<1x512x4xf32> to vector<512x4xf32>
    %c0_5 = arith.constant 0 : index
    %c0_6 = arith.constant 0 : index
    %4 = vector.load %arg4[%c0_5, %c0_6] : memref<3x64xf32, #tpu.memory_space<vmem>>, vector<3x64xf32>
    %cst = arith.constant dense<0.000000e+00> : vector<512x64xf32>
    %5 = tpu.matmul %1, %4, %cst {dimension_numbers = #tpu.dot_dimension_numbers<[1], [0], [0], [1], [0, 0, 1, 1], [], []>} : vector<512x3xf32>, vector<3x64xf32>, vector<512x64xf32> -> vector<512x64xf32>
    %c0_7 = arith.constant 0 : index
    %c0_8 = arith.constant 0 : index
    %6 = vector.load %arg5[%c0_7, %c0_8] : memref<4x64xf32, #tpu.memory_space<vmem>>, vector<4x64xf32>
    %cst_9 = arith.constant dense<0.000000e+00> : vector<512x64xf32>
    %7 = tpu.matmul %3, %6, %cst_9 {dimension_numbers = #tpu.dot_dimension_numbers<[1], [0], [0], [1], [0, 0, 1, 1], [], []>} : vector<512x4xf32>, vector<4x64xf32>, vector<512x64xf32> -> vector<512x64xf32>
    %8 = arith.addf %5, %7 : vector<512x64xf32>
    %c0_10 = arith.constant 0 : index
    %c0_11 = arith.constant 0 : index
    %9 = vector.load %arg6[%c0_10, %c0_11] : memref<1x64xf32, #tpu.memory_space<vmem>>, vector<1x64xf32>
    %10 = vector.broadcast %9 : vector<1x64xf32> to vector<512x64xf32>
    %11 = arith.addf %8, %10 : vector<512x64xf32>
    %cst_12 = arith.constant 0.000000e+00 : f32
    %12 = vector.broadcast %cst_12 : f32 to vector<512x64xf32>
    %13 = arith.maximumf %11, %12 : vector<512x64xf32>
    %c0_13 = arith.constant 0 : index
    %c0_14 = arith.constant 0 : index
    %14 = vector.load %arg7[%c0_13, %c0_14] : memref<32x64xf32, #tpu.memory_space<vmem>>, vector<32x64xf32>
    %15 = tpu.transpose %13, [1, 0] : vector<512x64xf32> -> vector<64x512xf32>
    %cst_15 = arith.constant dense<0.000000e+00> : vector<32x512xf32>
    %16 = tpu.matmul %14, %15, %cst_15 {dimension_numbers = #tpu.dot_dimension_numbers<[1], [0], [0], [1], [0, 0, 1, 1], [], []>} : vector<32x64xf32>, vector<64x512xf32>, vector<32x512xf32> -> vector<32x512xf32>
    %c0_16 = arith.constant 0 : index
    %c0_17 = arith.constant 0 : index
    %17 = vector.load %arg8[%c0_16, %c0_17] : memref<32x1xf32, #tpu.memory_space<vmem>>, vector<32x1xf32>
    %18 = vector.broadcast %17 : vector<32x1xf32> to vector<32x512xf32>
    %19 = arith.addf %16, %18 : vector<32x512xf32>
    %cst_18 = arith.constant 0.000000e+00 : f32
    %20 = vector.broadcast %cst_18 : f32 to vector<32x512xf32>
    %21 = arith.maximumf %19, %20 : vector<32x512xf32>
    %22 = vector.extract_strided_slice %21 {offsets = [0, 0], sizes = [16, 512], strides = [1, 1]} : vector<32x512xf32> to vector<16x512xf32>
    %23 = vector.extract_strided_slice %21 {offsets = [16, 0], sizes = [16, 512], strides = [1, 1]} : vector<32x512xf32> to vector<16x512xf32>
    %24 = arith.addf %22, %23 : vector<16x512xf32>
    %c0_19 = arith.constant 0 : index
    %c0_20 = arith.constant 0 : index
    %c0_21 = arith.constant 0 : index
    %25 = vector.load %arg9[%c0_19, %c0_20, %c0_21] : memref<1x16x512xf32, #tpu.memory_space<vmem>>, vector<1x16x512xf32>
    %26 = vector.shape_cast %25 : vector<1x16x512xf32> to vector<16x512xf32>
    %27 = vector.shape_cast %24 : vector<16x512xf32> to vector<1x16x512xf32>
    tpu.vector_store %arg9[%c0_19, %c0_20, %c0_21], %27 {strides = array<i32>} : memref<1x16x512xf32, #tpu.memory_space<vmem>>, vector<1x16x512xf32>,
    return
  }
  func.func @transform_0(%arg0: i32, %arg1: i32) -> (i32, i32, i32) {
    %c0_i32 = arith.constant 0 : i32
    %c0_i32_0 = arith.constant 0 : i32
    return %arg0, %arg1, %c0_i32 : i32, i32, i32
  }
  func.func @transform_1(%arg0: i32, %arg1: i32) -> (i32, i32, i32) {
    %c0_i32 = arith.constant 0 : i32
    %c0_i32_0 = arith.constant 0 : i32
    return %arg0, %arg1, %c0_i32 : i32, i32, i32
  }
  func.func @transform_2(%arg0: i32, %arg1: i32) -> (i32, i32) {
    %c0_i32 = arith.constant 0 : i32
    %c0_i32_0 = arith.constant 0 : i32
    %c0_i32_1 = arith.constant 0 : i32
    return %c0_i32, %c0_i32_0 : i32, i32
  }
  func.func @transform_3(%arg0: i32, %arg1: i32) -> (i32, i32) {
    %c0_i32 = arith.constant 0 : i32
    %c0_i32_0 = arith.constant 0 : i32
    %c0_i32_1 = arith.constant 0 : i32
    return %c0_i32, %c0_i32_0 : i32, i32
  }
  func.func @transform_4(%arg0: i32, %arg1: i32) -> (i32, i32) {
    %c0_i32 = arith.constant 0 : i32
    %c0_i32_0 = arith.constant 0 : i32
    %c0_i32_1 = arith.constant 0 : i32
    return %c0_i32, %c0_i32_0 : i32, i32
  }
  func.func @transform_5(%arg0: i32, %arg1: i32) -> (i32, i32) {
    %c0_i32 = arith.constant 0 : i32
    %c0_i32_0 = arith.constant 0 : i32
    %c0_i32_1 = arith.constant 0 : i32
    return %c0_i32, %c0_i32_0 : i32, i32
  }
  func.func @transform_6(%arg0: i32, %arg1: i32) -> (i32, i32) {
    %c0_i32 = arith.constant 0 : i32
    %c0_i32_0 = arith.constant 0 : i32
    %c0_i32_1 = arith.constant 0 : i32
    return %c0_i32, %c0_i32_0 : i32, i32
  }
  func.func @transform_7(%arg0: i32, %arg1: i32) -> (i32, i32, i32) {
    %c0_i32 = arith.constant 0 : i32
    %c0_i32_0 = arith.constant 0 : i32
    return %arg0, %c0_i32, %arg1 : i32, i32, i32
  }
}

</mosaic_0001>

<bundles_post_ra>
// kernel: tpu_custom_call.1
= control target key start
LH: loop header
LB: loop body
LE: loop exit
PB: predicated region body
PF: predicated region fallthrough
CT: control target
= control target key end

     0   :  { %s4004_s0 = inlined_call_operand.vmem [shape: f32[2,1024,3], index: 0, kind: input, shape index: {}]   ;;  %s4005_s1 = inlined_call_operand.vmem [shape: f32[2,1024,4], index: 1, kind: input, shape index: {}]   ;;  %s4006_s2 = inlined_call_operand.vmem [shape: f32[3,64], index: 2, kind: input, shape index: {}]   ;;  %s4007_s3 = inlined_call_operand.vmem [shape: f32[4,64], index: 3, kind: input, shape index: {}]   ;;  %s4008_s4 = inlined_call_operand.vmem [shape: f32[1,64], index: 4, kind: input, shape index: {}]   ;;  %s4009_s5 = inlined_call_operand.vmem [shape: f32[32,64], index: 5, kind: input, shape index: {}]   ;;  %s4010_s6 = inlined_call_operand.vmem [shape: f32[32,1], index: 6, kind: input, shape index: {}]   ;;  %s4011_s7 = inlined_call_operand.hbm [shape: f32[2,16,1024], index: 7, kind: output, shape index: {}]  }
   0x1   :  { %4012 = sst [smem:[#allocation5_spill]] %s4006_s2 }
   0x2   :  { %12 = vsyncpa [#allocation3], 0 }
   0x3   :  { %14 = vsyncpa [#allocation3 + $0x1], 0  ;;  %s3175_s24 = smov 0   ;;  %s3177_s25 = smov 0  }
   0x4   :  { %s3179_s26 = smov 0   ;;  %s3181_s27 = smov 0  }
   0x5   :  { %s3183_s28 = smov 0   ;;  %s3185_s29 = smov 0  }
   0x6   :  { %s3187_s30 = smov 0   ;;  %s3189_s8 = smov 0  }
   0x7 LB: > { %s2332_s9 = sadd.s32 4294967295, %s3128_s8   ;;  %s2333_s10 = sadd.s32 4294967294, %s3128_s8   ;;  %s3128_s8 = sphi %s3189_s8, %s20_s8   ;;  %s3124_s30 = sphi %s3187_s30, %s4022_s30   ;;  %s3120_s29 = sphi %s3185_s29, %s4021_s29   ;;  %s3116_s28 = sphi %s3183_s28, %s4020_s28   ;;  %s3112_s27 = sphi %s3181_s27, %s4019_s27   ;;  %s3108_s26 = sphi %s3179_s26, %s4018_s26   ;;  %s3104_s25 = sphi %s3177_s25, %s4017_s25   ;;  %s3100_s24 = sphi %s3175_s24, %s4016_s24  }
   0x8   : > { %s29_s11 = sadd.s32 1, %s3120_s29  ;;  %s32_s12 = sadd.s32 1, %s3124_s30 }
   0x9   : > { %p30_p0 = scmp.ge.s32.totalorder %s29_s11, 2  ;;  %p212_p1 = scmp.ne.s32.totalorder %s3108_s26, %s3104_s25 }
   0xa   : > { %p213_p2 = scmp.eq.s32.totalorder %s2332_s9, 3  ;;  %p218_p5 = scmp.ne.s32.totalorder %s3104_s25, %s3100_s24 }
   0xb   : > { %s4024_s11 = smov (%p30_p0, %s29_s11), 0  ;;  %s4026_s12 = smov (!%p30_p0, %s32_s12), %s3124_s30 }
   0xc   : > { %s198_s13 = ssub.s32 %s3120_s29, %s4024_s11  ;;  %p3226_p3 = por %p213_p2, %p212_p1 }
   0xd   : > { %p34_p4 = scmp.ge.s32.totalorder %s4026_s12, 2  ;;  %p219_p6 = scmp.eq.s32.totalorder %s2333_s10, 3 }
   0xe   : > { %p2336_p7 = scmp.ge.s32.totalorder %s3128_s8, 1  ;;  %p278_p9 = scmp.lt.s32.totalorder %s3128_s8, 5 }
   0xf   : > { %s4028_s12 = smov (%p34_p4, %s4026_s12), 0  ;;  %p3235_p8 = por %p219_p6, %p218_p5 }
  0x10   : > { %s197_s16 = ssub.s32 %s3124_s30, %s4028_s12  ;;  %s202_s17 = sadd.s32 1, %s3108_s26 }
  0x11   : > { %s199_s18 = sor.u32 %s198_s13, %s197_s16  ;;  %p279_p10 = pnand %p2336_p7, %p278_p9 }
  0x12   : > { %p200_p11 = scmp.eq.s32.totalorder %s199_s18, 0  ;;  %s4015_s2 = sld [smem:[#allocation5_spill]] (!%p279_p10) }
  0x13   : > { %282 = sbr.rel (%p279_p10) target bundleno = 648 (0x288), region = 48  ;;  %s2338_s9 = sshll.u32 (!%p279_p10), %s3112_s27, 6 }
  0x14   : > { %s3244_s19 = scalar_select %p200_p11, %s3108_s26, %s202_s17  }
  0x15   : > { %p324_p12 = scmp.lt.s32.totalorder (!%p279_p10), %s3116_s28, 1  ;;  %p326_p13 = scmp.lt.s32.totalorder (!%p279_p10), %s2338_s9, 127 }
  0x16   : > { %s320_s20 = sand.u32 (!%p279_p10), 1, %s3104_s25   ;;  %s2548_s23 = sshll.u32 (!%p279_p10), %s3112_s27, 2 }
  0x18   : > { %v473_v0 = vld [vmem:[%s4007_s3] sm:$0xf]  ;;  %vm667_vm0 = vcmask 1043456   ;;  %vm1249_vm1 = vcmask 1042432   ;;  %s325_s10 = scalar_select %p324_p12, %s3116_s28, 1  ;;  %vm474_vm2 = vcmask 31744  }
  0x19   : > { %v472_v1 = vld [vmem:[%s4015_s2] sm:$0x7]  ;;  %2763 = vmatprep.subr.msk.mxu0 %vm667_vm0, %v473_v0  ;;  %s4030_s9 = smov (!%p326_p13, %s2338_s9), 127  ;;  %vm1056_vm3 = vcmask 23552   ;;  %vm1801_vm4 = vcmask 523264  }
  0x1a   : > { %2861 = vmatprep.subr.msk.mxu1 %vm1249_vm1, %v472_v1  ;;  %2764 = vmatpush3.msk.msra.mxu0 %vm667_vm0, %v473_v0  ;;  %s2339_s13 = sshll.u32 %s325_s10, 7 }
  0x1b   : > { %2862 = vmatpush3.msk.msra.mxu1 %vm1249_vm1, %v472_v1  ;;  %s329_s16 = sadd.s32 %s2339_s13, %s4030_s9 }
  0x1c   : > { %s2340_s17 = sshll.u32 %s329_s16, 3 }
  0x1d   : > { %s3258_s21 = scalar_lea.vmem %s4005_s1, %s2340_s17  ;;  %s3263_s2 = scalar_lea.vmem %s4004_s0, %s2340_s17 }
  0x1e   : > { %v408_v2 = vld [vmem:[%s3258_s21] sm:$0xff]  ;;  %v409_v4 = vld [vmem:[%s3258_s21 + $0x8] sm:$0xff]  ;;  %v410_v6 = vld [vmem:[%s3258_s21 + $0x10] sm:$0xff]  ;;  %s3953_s17 = scalar_lea.sflag [#allocation3], %s320_s20 }
  0x1f   : > { %v344_v3 = vld [vmem:[%s3263_s2] sm:$0xff]  ;;  %2765 = vmatprep.mubr.msk.f32.mxu0 %vm474_vm2, %v408_v2  ;;  %v345_v5 = vld [vmem:[%s3263_s2 + $0x8] sm:$0xff]  ;;  %v346_v7 = vld [vmem:[%s3263_s2 + $0x10] sm:$0xff] }
  0x20   : > { %2863 = vmatprep.mubr.msk.f32.mxu1 %vm1056_vm3, %v344_v3  ;;  %2766 = vmatmul.mubr.msk.f32.vlgmr.msra.gmra.mxu0 %vm474_vm2, %v409_v4  ;;  %v411_v8 = vld [vmem:[%s3258_s21 + $0x18] sm:$0xff]  ;;  %v412_v10 = vld [vmem:[%s3258_s21 + $0x20] sm:$0xff]  ;;  %v413_v12 = vld [vmem:[%s3258_s21 + $0x28] sm:$0xff] }
  0x21   : > { %2864 = vmatmul.mubr.msk.f32.vlgmr.msra.gmra.mxu1 %vm1056_vm3, %v345_v5  ;;  %2768 = vmatprep.mubr.msk.f32.mxu0 %vm474_vm2, %v410_v6  ;;  %v347_v9 = vld [vmem:[%s3263_s2 + $0x18] sm:$0xff]  ;;  %v348_v11 = vld [vmem:[%s3263_s2 + $0x20] sm:$0xff]  ;;  %v349_v13 = vld [vmem:[%s3263_s2 + $0x28] sm:$0xff] }
  0x22   : > { %2866 = vmatprep.mubr.msk.f32.mxu1 %vm1056_vm3, %v346_v7  ;;  %v414_v14 = vld [vmem:[%s3258_s21 + $0x30] sm:$0xff]  ;;  %v415_v16 = vld [vmem:[%s3258_s21 + $0x38] sm:$0xff]  ;;  %v416_v18 = vld [vmem:[%s3258_s21 + $0x40] sm:$0xff] }
  0x23   : > { %v350_v15 = vld [vmem:[%s3263_s2 + $0x30] sm:$0xff]  ;;  %v351_v17 = vld [vmem:[%s3263_s2 + $0x38] sm:$0xff]  ;;  %v352_v19 = vld [vmem:[%s3263_s2 + $0x40] sm:$0xff] }
  0x24   : > { %2769 = vmatmul.mubr.msk.f32.gmra.mxu0 %vm474_vm2, %v411_v8  ;;  %v417_v20 = vld [vmem:[%s3258_s21 + $0x48] sm:$0xff]  ;;  %v418_v22 = vld [vmem:[%s3258_s21 + $0x50] sm:$0xff]  ;;  %v419_v24 = vld [vmem:[%s3258_s21 + $0x58] sm:$0xff] }
  0x25   : > { %2867 = vmatmul.mubr.msk.f32.gmra.mxu1 %vm1056_vm3, %v347_v9  ;;  %2771 = vmatprep.mubr.msk.f32.mxu0 %vm474_vm2, %v412_v10  ;;  %v353_v21 = vld [vmem:[%s3263_s2 + $0x48] sm:$0xff]  ;;  %v354_v23 = vld [vmem:[%s3263_s2 + $0x50] sm:$0xff]  ;;  %v355_v25 = vld [vmem:[%s3263_s2 + $0x58] sm:$0xff] }
  0x26   : > { %2869 = vmatprep.mubr.msk.f32.mxu1 %vm1056_vm3, %v348_v11  ;;  %v420_v26 = vld [vmem:[%s3258_s21 + $0x60] sm:$0xff]  ;;  %v421_v28 = vld [vmem:[%s3258_s21 + $0x68] sm:$0xff]  ;;  %v422_v30 = vld [vmem:[%s3258_s21 + $0x70] sm:$0xff] }
  0x27   : > { %v356_v27 = vld [vmem:[%s3263_s2 + $0x60] sm:$0xff]  ;;  %v357_v29 = vld [vmem:[%s3263_s2 + $0x68] sm:$0xff]  ;;  %v358_v31 = vld [vmem:[%s3263_s2 + $0x70] sm:$0xff] }
  0x28   : > { %2772 = vmatmul.mubr.msk.f32.gmra.mxu0 %vm474_vm2, %v413_v12  ;;  %v423_v32 = vld [vmem:[%s3258_s21 + $0x78] sm:$0xff]  ;;  %v424_v34 = vld [vmem:[%s3258_s21 + $0x80] sm:$0xff]  ;;  %v425_v36 = vld [vmem:[%s3258_s21 + $0x88] sm:$0xff] }
  0x29   : > { %2870 = vmatmul.mubr.msk.f32.gmra.mxu1 %vm1056_vm3, %v349_v13  ;;  %2774 = vmatprep.mubr.msk.f32.mxu0 %vm474_vm2, %v414_v14  ;;  %v359_v33 = vld [vmem:[%s3263_s2 + $0x78] sm:$0xff]  ;;  %v360_v35 = vld [vmem:[%s3263_s2 + $0x80] sm:$0xff]  ;;  %v361_v37 = vld [vmem:[%s3263_s2 + $0x88] sm:$0xff] }
  0x2a   : > { %2872 = vmatprep.mubr.msk.f32.mxu1 %vm1056_vm3, %v350_v15  ;;  %v426_v38 = vld [vmem:[%s3258_s21 + $0x90] sm:$0xff]  ;;  %v427_v40 = vld [vmem:[%s3258_s21 + $0x98] sm:$0xff]  ;;  %v428_v42 = vld [vmem:[%s3258_s21 + $0xa0] sm:$0xff] }
  0x2b   : > { %v362_v39 = vld [vmem:[%s3263_s2 + $0x90] sm:$0xff]  ;;  %v363_v41 = vld [vmem:[%s3263_s2 + $0x98] sm:$0xff]  ;;  %v364_v43 = vld [vmem:[%s3263_s2 + $0xa0] sm:$0xff] }
  0x2c   : > { %2775 = vmatmul.mubr.msk.f32.gmra.mxu0 %vm474_vm2, %v415_v16  ;;  %v429_v44 = vld [vmem:[%s3258_s21 + $0xa8] sm:$0xff]  ;;  %v430_v46 = vld [vmem:[%s3258_s21 + $0xb0] sm:$0xff]  ;;  %v431_v48 = vld [vmem:[%s3258_s21 + $0xb8] sm:$0xff] }
  0x2d   : > { %2873 = vmatmul.mubr.msk.f32.gmra.mxu1 %vm1056_vm3, %v351_v17  ;;  %2777 = vmatprep.mubr.msk.f32.mxu0 %vm474_vm2, %v416_v18  ;;  %v365_v45 = vld [vmem:[%s3263_s2 + $0xa8] sm:$0xff]  ;;  %v366_v47 = vld [vmem:[%s3263_s2 + $0xb0] sm:$0xff]  ;;  %v367_v49 = vld [vmem:[%s3263_s2 + $0xb8] sm:$0xff] }
  0x2e   : > { %2875 = vmatprep.mubr.msk.f32.mxu1 %vm1056_vm3, %v352_v19  ;;  %v432_v50 = vld [vmem:[%s3258_s21 + $0xc0] sm:$0xff]  ;;  %v433_v52 = vld [vmem:[%s3258_s21 + $0xc8] sm:$0xff]  ;;  %v434_v54 = vld [vmem:[%s3258_s21 + $0xd0] sm:$0xff] }
  0x2f   : > { %v368_v51 = vld [vmem:[%s3263_s2 + $0xc0] sm:$0xff]  ;;  %v369_v53 = vld [vmem:[%s3263_s2 + $0xc8] sm:$0xff]  ;;  %v370_v55 = vld [vmem:[%s3263_s2 + $0xd0] sm:$0xff] }
  0x30   : > { %2778 = vmatmul.mubr.msk.f32.gmra.mxu0 %vm474_vm2, %v417_v20  ;;  %v435_v56 = vld [vmem:[%s3258_s21 + $0xd8] sm:$0xff]  ;;  %v436_v58 = vld [vmem:[%s3258_s21 + $0xe0] sm:$0xff]  ;;  %v437_v60 = vld [vmem:[%s3258_s21 + $0xe8] sm:$0xff] }
  0x31   : > { %2876 = vmatmul.mubr.msk.f32.gmra.mxu1 %vm1056_vm3, %v353_v21  ;;  %2780 = vmatprep.mubr.msk.f32.mxu0 %vm474_vm2, %v418_v22  ;;  %v371_v57 = vld [vmem:[%s3263_s2 + $0xd8] sm:$0xff]  ;;  %v372_v59 = vld [vmem:[%s3263_s2 + $0xe0] sm:$0xff]  ;;  %v373_v61 = vld [vmem:[%s3263_s2 + $0xe8] sm:$0xff] }
  0x32   : > { %2878 = vmatprep.mubr.msk.f32.mxu1 %vm1056_vm3, %v354_v23  ;;  %v438_v62 = vld [vmem:[%s3258_s21 + $0xf0] sm:$0xff]  ;;  %v439_v0 = vld [vmem:[%s3258_s21 + $0xf8] sm:$0xff]  ;;  %v440_v2 = vld [vmem:[%s3258_s21 + $0x100] sm:$0xff] }
  0x33   : > { %v374_v63 = vld [vmem:[%s3263_s2 + $0xf0] sm:$0xff]  ;;  %v375_v1 = vld [vmem:[%s3263_s2 + $0xf8] sm:$0xff]  ;;  %v376_v3 = vld [vmem:[%s3263_s2 + $0x100] sm:$0xff] }
  0x34   : > { %2781 = vmatmul.mubr.msk.f32.gmra.mxu0 %vm474_vm2, %v419_v24  ;;  %v441_v4 = vld [vmem:[%s3258_s21 + $0x108] sm:$0xff]  ;;  %v442_v6 = vld [vmem:[%s3258_s21 + $0x110] sm:$0xff]  ;;  %v443_v8 = vld [vmem:[%s3258_s21 + $0x118] sm:$0xff] }
  0x35   : > { %2879 = vmatmul.mubr.msk.f32.gmra.mxu1 %vm1056_vm3, %v355_v25  ;;  %2783 = vmatprep.mubr.msk.f32.mxu0 %vm474_vm2, %v420_v26  ;;  %v377_v5 = vld [vmem:[%s3263_s2 + $0x108] sm:$0xff]  ;;  %v378_v7 = vld [vmem:[%s3263_s2 + $0x110] sm:$0xff]  ;;  %v379_v9 = vld [vmem:[%s3263_s2 + $0x118] sm:$0xff] }
  0x36   : > { %2881 = vmatprep.mubr.msk.f32.mxu1 %vm1056_vm3, %v356_v27  ;;  %v444_v10 = vld [vmem:[%s3258_s21 + $0x120] sm:$0xff]  ;;  %v445_v12 = vld [vmem:[%s3258_s21 + $0x128] sm:$0xff]  ;;  %v446_v14 = vld [vmem:[%s3258_s21 + $0x130] sm:$0xff] }
  0x37   : > { %v380_v11 = vld [vmem:[%s3263_s2 + $0x120] sm:$0xff]  ;;  %v381_v13 = vld [vmem:[%s3263_s2 + $0x128] sm:$0xff]  ;;  %v382_v15 = vld [vmem:[%s3263_s2 + $0x130] sm:$0xff] }
  0x38   : > { %2784 = vmatmul.mubr.msk.f32.gmra.mxu0 %vm474_vm2, %v421_v28  ;;  %v447_v16 = vld [vmem:[%s3258_s21 + $0x138] sm:$0xff]  ;;  %v448_v18 = vld [vmem:[%s3258_s21 + $0x140] sm:$0xff]  ;;  %v449_v20 = vld [vmem:[%s3258_s21 + $0x148] sm:$0xff] }
  0x39   : > { %2882 = vmatmul.mubr.msk.f32.gmra.mxu1 %vm1056_vm3, %v357_v29  ;;  %2786 = vmatprep.mubr.msk.f32.mxu0 %vm474_vm2, %v422_v30  ;;  %v383_v17 = vld [vmem:[%s3263_s2 + $0x138] sm:$0xff]  ;;  %v384_v19 = vld [vmem:[%s3263_s2 + $0x140] sm:$0xff]  ;;  %v385_v21 = vld [vmem:[%s3263_s2 + $0x148] sm:$0xff] }
  0x3a   : > { %2884 = vmatprep.mubr.msk.f32.mxu1 %vm1056_vm3, %v358_v31  ;;  %v450_v22 = vld [vmem:[%s3258_s21 + $0x150] sm:$0xff]  ;;  %v451_v24 = vld [vmem:[%s3258_s21 + $0x158] sm:$0xff]  ;;  %v452_v26 = vld [vmem:[%s3258_s21 + $0x160] sm:$0xff] }
  0x3b   : > { %v386_v23 = vld [vmem:[%s3263_s2 + $0x150] sm:$0xff]  ;;  %v387_v25 = vld [vmem:[%s3263_s2 + $0x158] sm:$0xff]  ;;  %v388_v27 = vld [vmem:[%s3263_s2 + $0x160] sm:$0xff] }
  0x3c   : > { %2787 = vmatmul.mubr.msk.f32.gmra.mxu0 %vm474_vm2, %v423_v32  ;;  %v453_v28 = vld [vmem:[%s3258_s21 + $0x168] sm:$0xff]  ;;  %v454_v30 = vld [vmem:[%s3258_s21 + $0x170] sm:$0xff]  ;;  %v455_v32 = vld [vmem:[%s3258_s21 + $0x178] sm:$0xff] }
  0x3d   : > { %2885 = vmatmul.mubr.msk.f32.gmra.mxu1 %vm1056_vm3, %v359_v33  ;;  %2789 = vmatprep.mubr.msk.f32.mxu0 %vm474_vm2, %v424_v34  ;;  %v389_v29 = vld [vmem:[%s3263_s2 + $0x168] sm:$0xff]  ;;  %v390_v31 = vld [vmem:[%s3263_s2 + $0x170] sm:$0xff]  ;;  %v391_v33 = vld [vmem:[%s3263_s2 + $0x178] sm:$0xff] }
  0x3e   : > { %2887 = vmatprep.mubr.msk.f32.mxu1 %vm1056_vm3, %v360_v35  ;;  %v456_v34 = vld [vmem:[%s3258_s21 + $0x180] sm:$0xff] }
  0x3f   : > { %v392_v35 = vld [vmem:[%s3263_s2 + $0x180] sm:$0xff] }
  0x40   : > { %2790 = vmatmul.mubr.msk.f32.gmra.mxu0 %vm474_vm2, %v425_v36  ;;  %v457_v36 = vld [vmem:[%s3258_s21 + $0x188] sm:$0xff] }
  0x41   : > { %2888 = vmatmul.mubr.msk.f32.gmra.mxu1 %vm1056_vm3, %v361_v37  ;;  %2792 = vmatprep.mubr.msk.f32.mxu0 %vm474_vm2, %v426_v38  ;;  %v393_v37 = vld [vmem:[%s3263_s2 + $0x188] sm:$0xff]  ;;  %v458_v38 = vld [vmem:[%s3258_s21 + $0x190] sm:$0xff] }
  0x42   : > { %2890 = vmatprep.mubr.msk.f32.mxu1 %vm1056_vm3, %v362_v39  ;;  %v394_v39 = vld [vmem:[%s3263_s2 + $0x190] sm:$0xff] }
  0x44   : > { %2793 = vmatmul.mubr.msk.f32.gmra.mxu0 %vm474_vm2, %v427_v40  ;;  %v459_v40 = vld [vmem:[%s3258_s21 + $0x198] sm:$0xff] }
  0x45   : > { %2891 = vmatmul.mubr.msk.f32.gmra.mxu1 %vm1056_vm3, %v363_v41  ;;  %2795 = vmatprep.mubr.msk.f32.mxu0 %vm474_vm2, %v428_v42  ;;  %v395_v41 = vld [vmem:[%s3263_s2 + $0x198] sm:$0xff]  ;;  %v460_v42 = vld [vmem:[%s3258_s21 + $0x1a0] sm:$0xff] }
  0x46   : > { %2893 = vmatprep.mubr.msk.f32.mxu1 %vm1056_vm3, %v364_v43  ;;  %v396_v43 = vld [vmem:[%s3263_s2 + $0x1a0] sm:$0xff] }
  0x48   : > { %2796 = vmatmul.mubr.msk.f32.gmra.mxu0 %vm474_vm2, %v429_v44  ;;  %v461_v44 = vld [vmem:[%s3258_s21 + $0x1a8] sm:$0xff] }
  0x49   : > { %2894 = vmatmul.mubr.msk.f32.gmra.mxu1 %vm1056_vm3, %v365_v45  ;;  %2798 = vmatprep.mubr.msk.f32.mxu0 %vm474_vm2, %v430_v46  ;;  %v397_v45 = vld [vmem:[%s3263_s2 + $0x1a8] sm:$0xff]  ;;  %v462_v46 = vld [vmem:[%s3258_s21 + $0x1b0] sm:$0xff] }
  0x4a   : > { %2896 = vmatprep.mubr.msk.f32.mxu1 %vm1056_vm3, %v366_v47  ;;  %v398_v47 = vld [vmem:[%s3263_s2 + $0x1b0] sm:$0xff] }
  0x4c   : > { %2799 = vmatmul.mubr.msk.f32.gmra.mxu0 %vm474_vm2, %v431_v48  ;;  %v463_v48 = vld [vmem:[%s3258_s21 + $0x1b8] sm:$0xff] }
  0x4d   : > { %2897 = vmatmul.mubr.msk.f32.gmra.mxu1 %vm1056_vm3, %v367_v49  ;;  %2801 = vmatprep.mubr.msk.f32.mxu0 %vm474_vm2, %v432_v50  ;;  %v399_v49 = vld [vmem:[%s3263_s2 + $0x1b8] sm:$0xff]  ;;  %v464_v50 = vld [vmem:[%s3258_s21 + $0x1c0] sm:$0xff] }
  0x4e   : > { %2899 = vmatprep.mubr.msk.f32.mxu1 %vm1056_vm3, %v368_v51  ;;  %v400_v51 = vld [vmem:[%s3263_s2 + $0x1c0] sm:$0xff] }
  0x50   : > { %2802 = vmatmul.mubr.msk.f32.gmra.mxu0 %vm474_vm2, %v433_v52  ;;  %v465_v52 = vld [vmem:[%s3258_s21 + $0x1c8] sm:$0xff] }
  0x51   : > { %2900 = vmatmul.mubr.msk.f32.gmra.mxu1 %vm1056_vm3, %v369_v53  ;;  %2804 = vmatprep.mubr.msk.f32.mxu0 %vm474_vm2, %v434_v54  ;;  %v401_v53 = vld [vmem:[%s3263_s2 + $0x1c8] sm:$0xff]  ;;  %v466_v54 = vld [vmem:[%s3258_s21 + $0x1d0] sm:$0xff] }
  0x52   : > { %2902 = vmatprep.mubr.msk.f32.mxu1 %vm1056_vm3, %v370_v55  ;;  %v402_v55 = vld [vmem:[%s3263_s2 + $0x1d0] sm:$0xff] }
  0x54   : > { %2805 = vmatmul.mubr.msk.f32.gmra.mxu0 %vm474_vm2, %v435_v56  ;;  %v467_v56 = vld [vmem:[%s3258_s21 + $0x1d8] sm:$0xff] }
  0x55   : > { %2903 = vmatmul.mubr.msk.f32.gmra.mxu1 %vm1056_vm3, %v371_v57  ;;  %2807 = vmatprep.mubr.msk.f32.mxu0 %vm474_vm2, %v436_v58  ;;  %v403_v57 = vld [vmem:[%s3263_s2 + $0x1d8] sm:$0xff]  ;;  %v468_v58 = vld [vmem:[%s3258_s21 + $0x1e0] sm:$0xff] }
  0x56   : > { %2905 = vmatprep.mubr.msk.f32.mxu1 %vm1056_vm3, %v372_v59  ;;  %v404_v59 = vld [vmem:[%s3263_s2 + $0x1e0] sm:$0xff] }
  0x58   : > { %2808 = vmatmul.mubr.msk.f32.gmra.mxu0 %vm474_vm2, %v437_v60  ;;  %v469_v60 = vld [vmem:[%s3258_s21 + $0x1e8] sm:$0xff] }
  0x59   : > { %2906 = vmatmul.mubr.msk.f32.gmra.mxu1 %vm1056_vm3, %v373_v61  ;;  %2810 = vmatprep.mubr.msk.f32.mxu0 %vm474_vm2, %v438_v62  ;;  %v405_v61 = vld [vmem:[%s3263_s2 + $0x1e8] sm:$0xff]  ;;  %v470_v62 = vld [vmem:[%s3258_s21 + $0x1f0] sm:$0xff] }
  0x5a   : > { %2908 = vmatprep.mubr.msk.f32.mxu1 %vm1056_vm3, %v374_v63  ;;  %v406_v63 = vld [vmem:[%s3263_s2 + $0x1f0] sm:$0xff] }
  0x5c   : > { %2811 = vmatmul.mubr.msk.f32.gmra.mxu0 %vm474_vm2, %v439_v0  ;;  %v471_v0 = vld [vmem:[%s3258_s21 + $0x1f8] sm:$0xff]  ;;  %s2337_s21 = sshll.u32 %s320_s20, 6 }
  0x5d   : > { %2909 = vmatmul.mubr.msk.f32.gmra.mxu1 %vm1056_vm3, %v375_v1  ;;  %2813 = vmatprep.mubr.msk.f32.mxu0 %vm474_vm2, %v440_v2  ;;  %v407_v1 = vld [vmem:[%s3263_s2 + $0x1f8] sm:$0xff]  ;;  %s3931_s22 = scalar_lea.vmem [#allocation2], %s2337_s21  ;;  %s2549_s2 = sshll.u32 %s3116_s28, 4 }
  0x5e   : > { %2911 = vmatprep.mubr.msk.f32.mxu1 %vm1056_vm3, %v376_v3  ;;  %s2229_s9 = sadd.s32 %s2549_s2, %s2548_s23  ;;  %s2232_s28 = sshll.u32 %s3931_s22, 4  ;;  %s3947_s28 = int_to_ptr.vmem [resolvable:$true] %s2232_s28 }
  0x5f   : > { %s2550_s27 = sshll.u32 %s2229_s9, 7  ;;  %s3036_s18 = scalar_lea.vmem %s3947_s28, 1024 }
  0x60   : > { %2814 = vmatmul.mubr.msk.f32.gmra.mxu0 %vm474_vm2, %v441_v4  ;;  %s3945_s16 = scalar_lea.hbm %s4011_s7, %s2550_s27  ;;  %p3037_p0 = scmp.ne.s32.totalorder %s3947_s28, %s3036_s18 }
  0x61   : > { %2912 = vmatmul.mubr.msk.f32.gmra.mxu1 %vm1056_vm3, %v377_v5  ;;  %2816 = vmatprep.mubr.msk.f32.mxu0 %vm474_vm2, %v442_v6  ;;  %s3131_s21 = smov [#allocation2]  }
  0x62   : > { %2914 = vmatprep.mubr.msk.f32.mxu1 %vm1056_vm3, %v378_v7  ;;  %p3038_p1 = pnand %p3037_p0, %p3226_p3  ;;  %s3040_s23 = sshll.u32 %s3131_s21, 4  ;;  %s3041_s23 = int_to_ptr.vmem [resolvable:$false] %s3040_s23 }
  0x63   : > { %s3042_s2 = scalar_lea.vmem %s3041_s23, 2048  ;;  %p3043_p4 = scmp.lt.s32.totalorder %s3947_s28, %s3041_s23 }
  0x64   : > { %2817 = vmatmul.mubr.msk.f32.gmra.mxu0 %vm474_vm2, %v443_v8  ;;  %p3039_p2 = pneg %p3038_p1  ;;  %p3044_p5 = scmp.lt.s32.totalorder %s3042_s2, %s3036_s18 }
  0x65   : > { %2915 = vmatmul.mubr.msk.f32.gmra.mxu1 %vm1056_vm3, %v379_v9  ;;  %2819 = vmatprep.mubr.msk.f32.mxu0 %vm474_vm2, %v444_v10 }
  0x66   : > { %2917 = vmatprep.mubr.msk.f32.mxu1 %vm1056_vm3, %v380_v11  ;;  %p3045_p6 = por %p3044_p5, %p3043_p4 }
  0x68   : > { %2820 = vmatmul.mubr.msk.f32.gmra.mxu0 %vm474_vm2, %v445_v12  ;;  %p3046_p7 = pnand %p3045_p6, %p3039_p2 }
  0x69   : > { %2918 = vmatmul.mubr.msk.f32.gmra.mxu1 %vm1056_vm3, %v381_v13  ;;  %2822 = vmatprep.mubr.msk.f32.mxu0 %vm474_vm2, %v446_v14 }
  0x6a   : > { %2920 = vmatprep.mubr.msk.f32.mxu1 %vm1056_vm3, %v382_v15 }
  0x6c   : > { %2823 = vmatmul.mubr.msk.f32.gmra.mxu0 %vm474_vm2, %v447_v16 }
  0x6d   : > { %2921 = vmatmul.mubr.msk.f32.gmra.mxu1 %vm1056_vm3, %v383_v17  ;;  %2825 = vmatprep.mubr.msk.f32.mxu0 %vm474_vm2, %v448_v18 }
  0x6e   : > { %2923 = vmatprep.mubr.msk.f32.mxu1 %vm1056_vm3, %v384_v19 }
  0x70   : > { %2826 = vmatmul.mubr.msk.f32.gmra.mxu0 %vm474_vm2, %v449_v20 }
  0x71   : > { %2924 = vmatmul.mubr.msk.f32.gmra.mxu1 %vm1056_vm3, %v385_v21  ;;  %2828 = vmatprep.mubr.msk.f32.mxu0 %vm474_vm2, %v450_v22 }
  0x72   : > { %2926 = vmatprep.mubr.msk.f32.mxu1 %vm1056_vm3, %v386_v23 }
  0x74   : > { %2829 = vmatmul.mubr.msk.f32.gmra.mxu0 %vm474_vm2, %v451_v24 }
  0x75   : > { %2927 = vmatmul.mubr.msk.f32.gmra.mxu1 %vm1056_vm3, %v387_v25  ;;  %2831 = vmatprep.mubr.msk.f32.mxu0 %vm474_vm2, %v452_v26 }
  0x76   : > { %2929 = vmatprep.mubr.msk.f32.mxu1 %vm1056_vm3, %v388_v27 }
  0x78   : > { %2832 = vmatmul.mubr.msk.f32.gmra.mxu0 %vm474_vm2, %v453_v28 }
  0x79   : > { %2930 = vmatmul.mubr.msk.f32.gmra.mxu1 %vm1056_vm3, %v389_v29  ;;  %2834 = vmatprep.mubr.msk.f32.mxu0 %vm474_vm2, %v454_v30 }
  0x7a   : > { %2932 = vmatprep.mubr.msk.f32.mxu1 %vm1056_vm3, %v390_v31 }
  0x7c   : > { %2835 = vmatmul.mubr.msk.f32.gmra.mxu0 %vm474_vm2, %v455_v32 }
  0x7d   : > { %2933 = vmatmul.mubr.msk.f32.gmra.mxu1 %vm1056_vm3, %v391_v33  ;;  %2837 = vmatprep.mubr.msk.f32.mxu0 %vm474_vm2, %v456_v34 }
  0x7e   : > { %2935 = vmatprep.mubr.msk.f32.mxu1 %vm1056_vm3, %v392_v35 }
  0x80   : > { %2838 = vmatmul.mubr.msk.f32.gmra.mxu0 %vm474_vm2, %v457_v36 }
  0x81   : > { %2936 = vmatmul.mubr.msk.f32.gmra.mxu1 %vm1056_vm3, %v393_v37  ;;  %2840 = vmatprep.mubr.msk.f32.mxu0 %vm474_vm2, %v458_v38 }
  0x82   : > { %2938 = vmatprep.mubr.msk.f32.mxu1 %vm1056_vm3, %v394_v39 }
  0x84   : > { %2841 = vmatmul.mubr.msk.f32.gmra.mxu0 %vm474_vm2, %v459_v40 }
  0x85   : > { %2939 = vmatmul.mubr.msk.f32.gmra.mxu1 %vm1056_vm3, %v395_v41  ;;  %2843 = vmatprep.mubr.msk.f32.mxu0 %vm474_vm2, %v460_v42 }
  0x86   : > { %2941 = vmatprep.mubr.msk.f32.mxu1 %vm1056_vm3, %v396_v43 }
  0x88   : > { %2844 = vmatmul.mubr.msk.f32.gmra.mxu0 %vm474_vm2, %v461_v44 }
  0x89   : > { %2942 = vmatmul.mubr.msk.f32.gmra.mxu1 %vm1056_vm3, %v397_v45  ;;  %2846 = vmatprep.mubr.msk.f32.mxu0 %vm474_vm2, %v462_v46 }
  0x8a   : > { %2944 = vmatprep.mubr.msk.f32.mxu1 %vm1056_vm3, %v398_v47 }
  0x8c   : > { %2847 = vmatmul.mubr.msk.f32.gmra.mxu0 %vm474_vm2, %v463_v48 }
  0x8d   : > { %2945 = vmatmul.mubr.msk.f32.gmra.mxu1 %vm1056_vm3, %v399_v49  ;;  %2849 = vmatprep.mubr.msk.f32.mxu0 %vm474_vm2, %v464_v50 }
  0x8e   : > { %2947 = vmatprep.mubr.msk.f32.mxu1 %vm1056_vm3, %v400_v51 }
  0x90   : > { %2850 = vmatmul.mubr.msk.f32.gmra.mxu0 %vm474_vm2, %v465_v52 }
  0x91   : > { %2948 = vmatmul.mubr.msk.f32.gmra.mxu1 %vm1056_vm3, %v401_v53  ;;  %2852 = vmatprep.mubr.msk.f32.mxu0 %vm474_vm2, %v466_v54 }
  0x92   : > { %2950 = vmatprep.mubr.msk.f32.mxu1 %vm1056_vm3, %v402_v55 }
  0x94   : > { %2853 = vmatmul.mubr.msk.f32.gmra.mxu0 %vm474_vm2, %v467_v56 }
  0x95   : > { %2951 = vmatmul.mubr.msk.f32.gmra.mxu1 %vm1056_vm3, %v403_v57  ;;  %2855 = vmatprep.mubr.msk.f32.mxu0 %vm474_vm2, %v468_v58 }
  0x96   : > { %2953 = vmatprep.mubr.msk.f32.mxu1 %vm1056_vm3, %v404_v59 }
  0x98   : > { %2856 = vmatmul.mubr.msk.f32.gmra.mxu0 %vm474_vm2, %v469_v60 }
  0x99   : > { %2954 = vmatmul.mubr.msk.f32.gmra.mxu1 %vm1056_vm3, %v405_v61  ;;  %2858 = vmatprep.mubr.msk.f32.mxu0 %vm474_vm2, %v470_v62 }
  0x9a   : > { %2956 = vmatprep.mubr.msk.f32.mxu1 %vm1056_vm3, %v406_v63 }
  0x9c   : > { %2859 = vmatmul.mubr.msk.f32.gmra.mxu0 %vm474_vm2, %v471_v0 }
  0x9d   : > { %2957 = vmatmul.mubr.msk.f32.gmra.mxu1 %vm1056_vm3, %v407_v1 }
  0xe0   : > { %v2767_v2 = vpop.f32.mrf.mxu0 }
  0xe1   : > { %v2865_v3 = vpop.f32.mrf.mxu1 }
  0xe2   : > { %v3521_v4 = vadd.f32 %v2865_v3, %v2767_v2  ;;  %v737_v5 = vpop.f32.mrf.mxu0 }
  0xe3   : > { %v1319_v6 = vpop.f32.mrf.mxu1 }
  0xe4   : > { %v3523_v7 = vadd.f32 %v1319_v6, %v737_v5  ;;  %v2770_v8 = vpop.f32.mrf.mxu0 }
  0xe5   : > { %v2868_v9 = vpop.f32.mrf.mxu1 }
  0xe6   : > { %v3525_v10 = vadd.f32 %v2868_v9, %v2770_v8  ;;  %v747_v11 = vpop.f32.mrf.mxu0 }
  0xe7   : > { %v1329_v12 = vpop.f32.mrf.mxu1 }
  0xe8   : > { %v3527_v13 = vadd.f32 %v1329_v12, %v747_v11  ;;  %v2773_v14 = vpop.f32.mrf.mxu0  ;;  %v3588_v11 = vld [vmem:[%s4009_s5] sm:$0xff] }
  0xe9   : > { %v2871_v15 = vpop.f32.mrf.mxu1  ;;  %2715 = vmatprep.mubr.msk.f32.mxu0 %vm1801_vm4, %v3588_v11  ;;  %2755 = vmatprep.mubr.msk.f32.mxu1 %vm1801_vm4, %v3588_v11 }
  0xea   : > { %v3529_v16 = vadd.f32 %v2871_v15, %v2773_v14  ;;  %v757_v17 = vpop.f32.mrf.mxu0 }
  0xeb   : > { %v1339_v18 = vpop.f32.mrf.mxu1 }
  0xec   : > { %v3531_v19 = vadd.f32 %v1339_v18, %v757_v17  ;;  %v2776_v20 = vpop.f32.mrf.mxu0 }
  0xed   : > { %v2874_v21 = vpop.f32.mrf.mxu1 }
  0xee   : > { %v3533_v22 = vadd.f32 %v2874_v21, %v2776_v20  ;;  %v767_v23 = vpop.f32.mrf.mxu0 }
  0xef   : > { %v1349_v24 = vpop.f32.mrf.mxu1 }
  0xf0   : > { %v3535_v25 = vadd.f32 %v1349_v24, %v767_v23  ;;  %v2779_v26 = vpop.f32.mrf.mxu0  ;;  %v3597_v23 = vld [vmem:[%s4008_s4] ss:$0 sm:$0xff] }
  0xf1   : > { %v2877_v27 = vpop.f32.mrf.mxu1 }
  0xf2   : > { %v3537_v28 = vadd.f32 %v2877_v27, %v2779_v26  ;;  %v777_v29 = vpop.f32.mrf.mxu0 }
  0xf3   : > { %v1359_v30 = vpop.f32.mrf.mxu1 }
  0xf4   : > { %v3539_v31 = vadd.f32 %v1359_v30, %v777_v29  ;;  %v3541_v32 = vpop.f32.mrf.mxu0 }
  0xf5   : > { %v3543_v33 = vpop.f32.mrf.mxu1 }
  0xf6   : > { %v3545_v34 = vpop.f32.mrf.mxu0 }
  0xf7   : > { %v3547_v35 = vpop.f32.mrf.mxu1 }
  0xf8   : > { %v2785_v36 = vpop.f32.mrf.mxu0 }
  0xf9   : > { %v2883_v37 = vpop.f32.mrf.mxu1 }
  0xfa   : > { %v3549_v38 = vpop.f32.mrf.mxu0 }
  0xfb   : > { %v3551_v39 = vpop.f32.mrf.mxu1 }
  0xfc   : > { %v2788_v40 = vpop.f32.mrf.mxu0 }
  0xfd   : > { %v2886_v41 = vpop.f32.mrf.mxu1 }
  0xfe   : > { %v807_v42 = vpop.f32.mrf.mxu0  ;;  %v1395_v15 = vadd.f32 %v2886_v41, %v2788_v40 }
  0xff   : > { %v1389_v43 = vpop.f32.mrf.mxu1 }
 0x100   : > { %v2791_v44 = vpop.f32.mrf.mxu0  ;;  %v1660_v26 = vadd.f32 %v3597_v23, %v1395_v15  ;;  %v1390_v27 = vadd.f32 %v1389_v43, %v807_v42 }
 0x101   : > { %v2889_v45 = vpop.f32.mrf.mxu1 }
 0x102   : > { %v3553_v46 = vadd.f32 %v2889_v45, %v2791_v44  ;;  %v817_v47 = vpop.f32.mrf.mxu0 }
 0x103   : > { %v1399_v48 = vpop.f32.mrf.mxu1 }
 0x104   : > { %v3555_v49 = vadd.f32 %v1399_v48, %v817_v47  ;;  %v2794_v50 = vpop.f32.mrf.mxu0 }
 0x105   : > { %v2892_v51 = vpop.f32.mrf.mxu1 }
 0x106   : > { %v3557_v52 = vadd.f32 %v2892_v51, %v2794_v50  ;;  %v827_v53 = vpop.f32.mrf.mxu0 }
 0x107   : > { %v1409_v54 = vpop.f32.mrf.mxu1 }
 0x108   : > { %v3559_v55 = vadd.f32 %v1409_v54, %v827_v53  ;;  %v3561_v56 = vpop.f32.mrf.mxu0  ;;  %v1385_v53 = vadd.f32 %v2883_v37, %v2785_v36  ;;  %v1724_v54 = vmax.f32 %v1660_v26, 0.0  ;;  %v1380_v37 = vadd.f32 %v3551_v39, %v3549_v38 }
 0x109   : > { %v3563_v57 = vpop.f32.mrf.mxu1  ;;  %v1375_v38 = vadd.f32 %v3543_v33, %v3541_v32  ;;  %v1370_v33 = vadd.f32 %v3547_v35, %v3545_v34 }
 0x10a   : > { %v3565_v58 = vpop.f32.mrf.mxu0  ;;  %v1658_v36 = vadd.f32 %v3597_v23, %v1385_v53 }
 0x10b   : > { %v3567_v59 = vpop.f32.mrf.mxu1  ;;  %v1656_v32 = vadd.f32 %v3597_v23, %v1375_v38 }
 0x10c   : > { %v3569_v60 = vpop.f32.mrf.mxu0  ;;  %v1722_v39 = vmax.f32 %v1658_v36, 0.0 }
 0x10d   : > { %v3571_v61 = vpop.f32.mrf.mxu1 }
 0x10e   : > { %v3573_v62 = vpop.f32.mrf.mxu0 }
 0x10f   : > { %v3575_v63 = vpop.f32.mrf.mxu1 }
 0x110   : > { %v3577_v0 = vpop.f32.mrf.mxu0 }
 0x111   : > { %v3579_v1 = vpop.f32.mrf.mxu1 }
 0x112   : > { %v3581_v2 = vpop.f32.mrf.mxu0 }
 0x113   : > { %v3583_v3 = vpop.f32.mrf.mxu1 }
 0x114   : > { %v2806_v5 = vpop.f32.mrf.mxu0 }
 0x115   : > { %v2904_v6 = vpop.f32.mrf.mxu1 }
 0x116   : > { %v867_v8 = vpop.f32.mrf.mxu0 }
 0x117   : > { %v1449_v9 = vpop.f32.mrf.mxu1 }
 0x118   : > { %v2809_v12 = vpop.f32.mrf.mxu0 }
 0x119   : > { %v2907_v14 = vpop.f32.mrf.mxu1 }
 0x11a   : > { %v877_v17 = vpop.f32.mrf.mxu0  ;;  %v1465_v44 = vadd.f32 %v2907_v14, %v2809_v12 }
 0x11b   : > { %v1459_v18 = vpop.f32.mrf.mxu1 }
 0x11c   : > { %v2812_v20 = vpop.f32.mrf.mxu0  ;;  %v1674_v42 = vadd.f32 %v3597_v23, %v1465_v44  ;;  %v1460_v43 = vadd.f32 %v1459_v18, %v877_v17 }
 0x11d   : > { %v2910_v21 = vpop.f32.mrf.mxu1 }
 0x11e   : > { %v1475_v24 = vadd.f32 %v2910_v21, %v2812_v20  ;;  %v887_v29 = vpop.f32.mrf.mxu0  ;;  %v1659_v20 = vadd.f32 %v3597_v23, %v1390_v27  ;;  %v1455_v27 = vadd.f32 %v2904_v6, %v2806_v5  ;;  %v1738_v44 = vmax.f32 %v1674_v42, 0.0 }
 0x11f   : > { %v1469_v30 = vpop.f32.mrf.mxu1 }
 0x120   : > { %v1676_v45 = vadd.f32 %v3597_v23, %v1475_v24  ;;  %v1470_v47 = vadd.f32 %v1469_v30, %v887_v29  ;;  %v2815_v40 = vpop.f32.mrf.mxu0  ;;  %v1723_v26 = vmax.f32 %v1659_v20, 0.0  ;;  %v1672_v53 = vadd.f32 %v3597_v23, %v1455_v27 }
 0x121   : > { %v2913_v41 = vpop.f32.mrf.mxu1  ;;  %v1655_v27 = vadd.f32 %v3597_v23, %v1370_v33 }
 0x122   : > { %v1740_v48 = vmax.f32 %v1676_v45, 0.0  ;;  %v1675_v50 = vadd.f32 %v3597_v23, %v1470_v47  ;;  %v3602_v51 = vadd.f32 %v2913_v41, %v2815_v40  ;;  %v897_v21 = vpop.f32.mrf.mxu0  ;;  %v1673_v45 = vadd.f32 %v3597_v23, %v1460_v43 }
 0x123   : > { %v1479_v15 = vpop.f32.mrf.mxu1 }
 0x124   : > { %v1739_v12 = vmax.f32 %v1675_v50, 0.0  ;;  %v3606_v14 = vadd.f32 %v1479_v15, %v897_v21  ;;  %2683 = vmatprep.subr.msk.mxu0 %vm1801_vm4, %v1740_v48  ;;  %v2818_v24 = vpop.f32.mrf.mxu0  ;;  %v1657_v50 = vadd.f32 %v3597_v23, %v1380_v37  ;;  %v1737_v20 = vmax.f32 %v1673_v45, 0.0 }
 0x125   : > { %v2916_v29 = vpop.f32.mrf.mxu1  ;;  %2684 = vmatpush3.xpose.msk.msra.mxu0 %vm1801_vm4, %v1724_v54  ;;  %v1450_v54 = vadd.f32 %v1449_v9, %v867_v8  ;;  %v1445_v8 = vadd.f32 %v3579_v1, %v3577_v0  ;;  %v3130_v0 = vmov 0  }
 0x126   : > { %v3610_v30 = vadd.f32 %v2916_v29, %v2818_v24  ;;  %2685 = vmatprep.subr.msk.mxu0 %vm1801_vm4, %v1739_v12  ;;  %v907_v17 = vpop.f32.mrf.mxu0  ;;  %v1721_v12 = vmax.f32 %v1657_v50, 0.0  ;;  %v1736_v29 = vmax.f32 %v1672_v53, 0.0  ;;  %3035 = vset.pattern.permute.xlu1 %v3130_v0  ;;  %v1780_v50 = vld [vmem:[%s4010_s6 + $0x18] sm:$0xff] }
 0x127   : > { %v1489_v18 = vpop.f32.mrf.mxu1  ;;  %v1671_v36 = vadd.f32 %v3597_v23, %v1450_v54  ;;  %3034 = vset.pattern.permute.xlu0 %v3130_v0 }
 0x128   : > { %v3617_v47 = vadd.f32 %v1489_v18, %v907_v17  ;;  %v2821_v40 = vpop.f32.mrf.mxu0  ;;  %v1777_v17 = vld [vmem:[%s4010_s6] sm:$0xff]  ;;  %v1720_v18 = vmax.f32 %v1656_v32, 0.0 }
 0x129   : > { %v2919_v41 = vpop.f32.mrf.mxu1  ;;  %2686 = vmatpush3.xpose.msk.msra.mxu0 %vm1801_vm4, %v1723_v26  ;;  %v1779_v26 = vld [vmem:[%s4010_s6 + $0x10] sm:$0xff]  ;;  %1783 = vperm.xlu0 %3034, %v1777_v17   ;;  %v1735_v38 = vmax.f32 %v1671_v36, 0.0 }
 0x12a   : > { %v3620_v48 = vadd.f32 %v2919_v41, %v2821_v40  ;;  %2687 = vmatprep.subr.msk.mxu0 %vm1801_vm4, %v1738_v44  ;;  %v917_v5 = vpop.f32.mrf.mxu0  ;;  %1793 = vperm.xlu1 %3035, %v1779_v26   ;;  %v1670_v40 = vadd.f32 %v3597_v23, %v1445_v8  ;;  %v1440_v41 = vadd.f32 %v3583_v3, %v3581_v2  ;;  %v1719_v3 = vmax.f32 %v1655_v27, 0.0 }
 0x12b   : > { %v1499_v6 = vpop.f32.mrf.mxu1  ;;  %v1654_v2 = vadd.f32 %v3597_v23, %v3537_v28  ;;  %v1653_v8 = vadd.f32 %v3597_v23, %v3539_v31  ;;  %v1652_v31 = vadd.f32 %v3597_v23, %v3533_v22 }
 0x12c   : > { %v3627_v21 = vadd.f32 %v1499_v6, %v917_v5  ;;  %v2824_v15 = vpop.f32.mrf.mxu0  ;;  %v1778_v5 = vld [vmem:[%s4010_s6 + $0x8] sm:$0xff]  ;;  %v1669_v32 = vadd.f32 %v3597_v23, %v1440_v41 }
 0x12d   : > { %v2922_v42 = vpop.f32.mrf.mxu1  ;;  %2688 = vmatpush3.xpose.msk.msra.mxu0 %vm1801_vm4, %v1722_v39  ;;  %1788 = vperm.xlu0 %3034, %v1778_v5   ;;  %v1718_v28 = vmax.f32 %v1654_v2, 0.0  ;;  %v1717_v17 = vmax.f32 %v1653_v8, 0.0  ;;  %v1716_v22 = vmax.f32 %v1652_v31, 0.0 }
 0x12e   : > { %v3630_v43 = vadd.f32 %v2922_v42, %v2824_v15  ;;  %2689 = vmatprep.subr.msk.mxu0 %vm1801_vm4, %v1737_v20  ;;  %v927_v9 = vpop.f32.mrf.mxu0  ;;  %1798 = vperm.xlu1 %3035, %v1780_v50   ;;  %v1435_v15 = vadd.f32 %v3571_v61, %v3569_v60  ;;  %v1734_v42 = vmax.f32 %v1670_v40, 0.0  ;;  %v1430_v61 = vadd.f32 %v3575_v63, %v3573_v62 }
 0x12f   : > { %v1509_v24 = vpop.f32.mrf.mxu1  ;;  %v1425_v62 = vadd.f32 %v3563_v57, %v3561_v56  ;;  %v1420_v56 = vadd.f32 %v3567_v59, %v3565_v58 }
 0x130   : > { %v3639_v37 = vadd.f32 %v1509_v24, %v927_v9  ;;  %v2827_v34 = vpop.f32.mrf.mxu0  ;;  %v1668_v60 = vadd.f32 %v3597_v23, %v1435_v15  ;;  %v1667_v0 = vadd.f32 %v3597_v23, %v1430_v61 }
 0x131   : > { %v2925_v35 = vpop.f32.mrf.mxu1  ;;  %2690 = vmatpush3.xpose.msk.msra.mxu0 %vm1801_vm4, %v1721_v12  ;;  %v1665_v58 = vadd.f32 %v3597_v23, %v1420_v56 }
 0x132   : > { %v3648_v1 = vadd.f32 %v2925_v35, %v2827_v34  ;;  %2691 = vmatprep.subr.msk.mxu0 %vm1801_vm4, %v1736_v29  ;;  %v937_v44 = vpop.f32.mrf.mxu0  ;;  %v1733_v29 = vmax.f32 %v1669_v32, 0.0  ;;  %v1732_v63 = vmax.f32 %v1668_v60, 0.0  ;;  %v1731_v57 = vmax.f32 %v1667_v0, 0.0 }
 0x133   : > { %v1519_v45 = vpop.f32.mrf.mxu1 }
 0x134   : > { %v3655_v39 = vadd.f32 %v1519_v45, %v937_v44  ;;  %v3663_v6 = vpop.f32.mrf.mxu0  ;;  %v1651_v45 = vadd.f32 %v3597_v23, %v3535_v25  ;;  %v1650_v25 = vadd.f32 %v3597_v23, %v3529_v16  ;;  %v1649_v16 = vadd.f32 %v3597_v23, %v3531_v19 }
 0x135   : > { %v3665_v53 = vpop.f32.mrf.mxu1  ;;  %2692 = vmatpush3.xpose.msk.msra.mxu0 %vm1801_vm4, %v1720_v18 }
 0x136   : > { %2693 = vmatprep.subr.msk.mxu0 %vm1801_vm4, %v1735_v38  ;;  %v3671_v54 = vpop.f32.mrf.mxu0  ;;  %v1666_v38 = vadd.f32 %v3597_v23, %v1425_v62  ;;  %v1715_v15 = vmax.f32 %v1651_v45, 0.0  ;;  %v1714_v61 = vmax.f32 %v1650_v25, 0.0  ;;  %v1729_v62 = vmax.f32 %v1665_v58, 0.0 }
 0x137   : > { %v3673_v20 = vpop.f32.mrf.mxu1  ;;  %v1713_v19 = vmax.f32 %v1649_v16, 0.0  ;;  %v1661_v58 = vadd.f32 %v3597_v23, %v3555_v49 }
 0x138   : > { %v3678_v33 = vpop.f32.mrf.mxu0 }
 0x139   : > { %v3680_v12 = vpop.f32.mrf.mxu1  ;;  %2694 = vmatpush3.xpose.msk.msra.mxu0 %vm1801_vm4, %v1719_v3 }
 0x13a   : > { %2695 = vmatprep.subr.msk.mxu0 %vm1801_vm4, %v1734_v42  ;;  %v3686_v9 = vpop.f32.mrf.mxu0 }
 0x13b   : > { %v3688_v24 = vpop.f32.mrf.mxu1 }
 0x13c   : > { %v3693_v36 = vpop.f32.mrf.mxu0 }
 0x13d   : > { %v3695_v26 = vpop.f32.mrf.mxu1  ;;  %2696 = vmatpush3.xpose.msk.msra.mxu0 %vm1801_vm4, %v1718_v28  ;;  %v1730_v28 = vmax.f32 %v1666_v38, 0.0 }
 0x13e   : > { %2697 = vmatprep.subr.msk.mxu0 %vm1801_vm4, %v1733_v29  ;;  %v3701_v34 = vpop.f32.mrf.mxu0 }
 0x13f   : > { %v3703_v35 = vpop.f32.mrf.mxu1 }
 0x140   : > { %v2839_v18 = vpop.f32.mrf.mxu0 }
 0x141   : > { %v2937_v27 = vpop.f32.mrf.mxu1  ;;  %2698 = vmatpush3.xpose.msk.msra.mxu0 %vm1801_vm4, %v1717_v17  ;;  %v1664_v17 = vadd.f32 %v3597_v23, %v3557_v52  ;;  %v1663_v52 = vadd.f32 %v3597_v23, %v3559_v55 }
 0x142   : > { %v3709_v44 = vadd.f32 %v2937_v27, %v2839_v18  ;;  %2699 = vmatprep.subr.msk.mxu0 %vm1801_vm4, %v1732_v63  ;;  %v977_v40 = vpop.f32.mrf.mxu0  ;;  %v1648_v18 = vadd.f32 %v3597_v23, %v3525_v10  ;;  %v1647_v10 = vadd.f32 %v3597_v23, %v3527_v13 }
 0x143   : > { %v1559_v41 = vpop.f32.mrf.mxu1  ;;  %v1728_v45 = vmax.f32 %v1664_v17, 0.0  ;;  %v1727_v55 = vmax.f32 %v1663_v52, 0.0  ;;  %v1645_v17 = vadd.f32 %v3597_v23, %v3523_v7 }
 0x144   : > { %v3717_v50 = vadd.f32 %v1559_v41, %v977_v40  ;;  %v2842_v5 = vpop.f32.mrf.mxu0  ;;  %v1712_v38 = vmax.f32 %v1648_v18, 0.0 }
 0x145   : > { %v2940_v2 = vpop.f32.mrf.mxu1  ;;  %2700 = vmatpush3.xpose.msk.msra.mxu0 %vm1801_vm4, %v1716_v22 }
 0x146   : > { %v3720_v3 = vadd.f32 %v2940_v2, %v2842_v5  ;;  %2701 = vmatprep.subr.msk.mxu0 %vm1801_vm4, %v1731_v57  ;;  %v987_v42 = vpop.f32.mrf.mxu0  ;;  %v1662_v5 = vadd.f32 %v3597_v23, %v3553_v46 }
 0x147   : > { %v1569_v32 = vpop.f32.mrf.mxu1 }
 0x148   : > { %v3726_v59 = vadd.f32 %v1569_v32, %v987_v42  ;;  %v3728_v8 = vpop.f32.mrf.mxu0  ;;  %v1711_v42 = vmax.f32 %v1647_v10, 0.0 }
 0x149   : > { %v3730_v60 = vpop.f32.mrf.mxu1  ;;  %2702 = vmatpush3.xpose.msk.msra.mxu0 %vm1801_vm4, %v1715_v15  ;;  %v1646_v15 = vadd.f32 %v3597_v23, %v3521_v4  ;;  %v1555_v4 = vadd.f32 %v3695_v26, %v3693_v36 }
 0x14a   : > { %2703 = vmatprep.subr.msk.mxu0 %vm1801_vm4, %v1730_v28  ;;  %v3736_v29 = vpop.f32.mrf.mxu0  ;;  %v1726_v28 = vmax.f32 %v1662_v5, 0.0  ;;  %v1550_v5 = vadd.f32 %v3703_v35, %v3701_v34 }
 0x14b   : > { %v3738_v31 = vpop.f32.mrf.mxu1  ;;  %v1710_v46 = vmax.f32 %v1646_v15, 0.0  ;;  %v1692_v10 = vadd.f32 %v3597_v23, %v1555_v4  ;;  %v1540_v4 = vadd.f32 %v3688_v24, %v3686_v9  ;;  %v1535_v9 = vadd.f32 %v3665_v53, %v3663_v6 }
 0x14c   : > { %v3742_v63 = vpop.f32.mrf.mxu0  ;;  %v1691_v35 = vadd.f32 %v3597_v23, %v1550_v5  ;;  %v1530_v6 = vadd.f32 %v3673_v20, %v3671_v54 }
 0x14d   : > { %v3744_v0 = vpop.f32.mrf.mxu1  ;;  %2704 = vmatpush3.xpose.msk.msra.mxu0 %vm1801_vm4, %v1714_v61  ;;  %v1756_v34 = vmax.f32 %v1692_v10, 0.0  ;;  %v1688_v10 = vadd.f32 %v3597_v23, %v1535_v9 }
 0x14e   : > { %2705 = vmatprep.subr.msk.mxu0 %vm1801_vm4, %v1729_v62  ;;  %v3750_v27 = vpop.f32.mrf.mxu0 }
 0x14f   : > { %v3752_v22 = vpop.f32.mrf.mxu1 }
 0x150   : > { %v3756_v40 = vpop.f32.mrf.mxu0 }
 0x151   : > { %v3758_v41 = vpop.f32.mrf.mxu1  ;;  %2706 = vmatpush3.xpose.msk.msra.mxu0 %vm1801_vm4, %v1713_v19  ;;  %v1725_v19 = vmax.f32 %v1661_v58, 0.0  ;;  %v3793_v58 = vld [vmem:[%s4009_s5 + $0x8] sm:$0xff] }
 0x152   : > { %2707 = vmatprep.subr.msk.mxu0 %vm1801_vm4, %v1728_v45  ;;  %v3764_v56 = vpop.f32.mrf.mxu0 }
 0x153   : > { %v3766_v57 = vpop.f32.mrf.mxu1 }
 0x154   : > { %v2854_v2 = vpop.f32.mrf.mxu0  ;;  %v1600_v54 = vadd.f32 %v3766_v57, %v3764_v56  ;;  %v1685_v57 = vadd.f32 %v3597_v23, %v3655_v39 }
 0x155   : > { %v2952_v25 = vpop.f32.mrf.mxu1  ;;  %2708 = vmatpush3.xpose.msk.msra.mxu0 %vm1801_vm4, %v1712_v38  ;;  %v1709_v38 = vmax.f32 %v1645_v17, 0.0 }
 0x156   : > { %2709 = vmatprep.subr.msk.mxu0 %vm1801_vm4, %v1727_v55  ;;  %v1027_v32 = vpop.f32.mrf.mxu0 }
 0x157   : > { %v1609_v13 = vpop.f32.mrf.mxu1 }
 0x158   : > { %v2857_v61 = vpop.f32.mrf.mxu0 }
 0x159   : > { %v2955_v16 = vpop.f32.mrf.mxu1  ;;  %2710 = vmatpush3.xpose.msk.msra.mxu0 %vm1801_vm4, %v1711_v42 }
 0x15a   : > { %2711 = vmatprep.subr.msk.mxu0 %vm1801_vm4, %v1726_v28  ;;  %v1037_v62 = vpop.f32.mrf.mxu0  ;;  %v1625_v15 = vadd.f32 %v2955_v16, %v2857_v61 }
 0x15b   : > { %v1619_v18 = vpop.f32.mrf.mxu1 }
 0x15c   : > { %v2860_v45 = vpop.f32.mrf.mxu0  ;;  %v1706_v61 = vadd.f32 %v3597_v23, %v1625_v15  ;;  %v1620_v16 = vadd.f32 %v1619_v18, %v1037_v62  ;;  %v1755_v62 = vmax.f32 %v1691_v35, 0.0  ;;  %v1615_v18 = vadd.f32 %v2952_v25, %v2854_v2 }
 0x15d   : > { %v2958_v52 = vpop.f32.mrf.mxu1  ;;  %2712 = vmatpush3.xpose.msk.msra.mxu0 %vm1801_vm4, %v1710_v46  ;;  %v1545_v46 = vadd.f32 %v3680_v12, %v3678_v33  ;;  %v3809_v33 = vld [vmem:[%s4009_s5 + $0x10] sm:$0xff]  ;;  %v1689_v2 = vadd.f32 %v3597_v23, %v1540_v4 }
 0x15e   : > { %v1635_v49 = vadd.f32 %v2958_v52, %v2860_v45  ;;  %2713 = vmatprep.subr.msk.mxu0 %vm1801_vm4, %v1725_v19  ;;  %v1047_v7 = vpop.f32.mrf.mxu0  ;;  %v1770_v19 = vmax.f32 %v1706_v61, 0.0  ;;  %v1705_v45 = vadd.f32 %v3597_v23, %v1620_v16  ;;  %v3824_v52 = vld [vmem:[%s4009_s5 + $0x18] sm:$0xff]  ;;  %v1704_v25 = vadd.f32 %v3597_v23, %v1615_v18 }
 0x15f   : > { %v1629_v55 = vpop.f32.mrf.mxu1  ;;  %v1690_v12 = vadd.f32 %v3597_v23, %v1545_v46  ;;  %v1753_v53 = vmax.f32 %v1689_v2, 0.0  ;;  %v1693_v2 = vadd.f32 %v3597_v23, %v3717_v50 }
 0x160   : > { %v1708_v36 = vadd.f32 %v3597_v23, %v1635_v49  ;;  %v1630_v26 = vadd.f32 %v1629_v55, %v1047_v7  ;;  %v1610_v49 = vadd.f32 %v1609_v13, %v1027_v32  ;;  %v1605_v32 = vadd.f32 %v3758_v41, %v3756_v40 }
 0x161   : > { %2714 = vmatpush3.xpose.msk.msra.mxu0 %vm1801_vm4, %v1709_v38  ;;  %v1754_v24 = vmax.f32 %v1690_v12, 0.0  ;;  %v1769_v38 = vmax.f32 %v1705_v45, 0.0  ;;  %v1768_v13 = vmax.f32 %v1704_v25, 0.0  ;;  %v1752_v7 = vmax.f32 %v1688_v10, 0.0 }
 0x162   : > { %v1772_v42 = vmax.f32 %v1708_v36, 0.0  ;;  %v1707_v28 = vadd.f32 %v3597_v23, %v1630_v26  ;;  %v1703_v5 = vadd.f32 %v3597_v23, %v1610_v49  ;;  %v1687_v55 = vadd.f32 %v3597_v23, %v1530_v6 }
 0x163   : > { %v1702_v15 = vadd.f32 %v3597_v23, %v1605_v32  ;;  %v1686_v40 = vadd.f32 %v3597_v23, %v3648_v1  ;;  %v1595_v36 = vadd.f32 %v3744_v0, %v3742_v63  ;;  %v1590_v1 = vadd.f32 %v3752_v22, %v3750_v27 }
 0x164   : > { %v1771_v17 = vmax.f32 %v1707_v28, 0.0  ;;  %2723 = vmatprep.subr.msk.mxu1 %vm1801_vm4, %v1772_v42  ;;  %2716 = vmatmul.mubr.msk.f32.vlgmr.msra.gmra.mxu0 %vm1801_vm4, %v3588_v11  ;;  %v1767_v20 = vmax.f32 %v1703_v5, 0.0  ;;  %v1751_v41 = vmax.f32 %v1687_v55, 0.0  ;;  %v1701_v42 = vadd.f32 %v3597_v23, %v1600_v54 }
 0x165   : > { %2724 = vmatpush3.xpose.msk.msra.mxu1 %vm1801_vm4, %v1756_v34  ;;  %2717 = vmatprep.mubr.msk.f32.mxu0 %vm1801_vm4, %v3793_v58  ;;  %v1766_v26 = vmax.f32 %v1702_v15, 0.0  ;;  %v1750_v56 = vmax.f32 %v1686_v40, 0.0  ;;  %v1700_v28 = vadd.f32 %v3597_v23, %v1595_v36  ;;  %v1684_v63 = vadd.f32 %v3597_v23, %v3630_v43 }
 0x166   : > { %2725 = vmatprep.subr.msk.mxu1 %vm1801_vm4, %v1771_v17  ;;  %v1765_v46 = vmax.f32 %v1701_v42, 0.0  ;;  %v1749_v0 = vmax.f32 %v1685_v57, 0.0  ;;  %v1585_v34 = vadd.f32 %v3730_v60, %v3728_v8  ;;  %v1699_v39 = vadd.f32 %v3597_v23, %v1590_v1 }
 0x167   : > { %v1764_v35 = vmax.f32 %v1700_v28, 0.0  ;;  %v1748_v27 = vmax.f32 %v1684_v63, 0.0  ;;  %v1683_v22 = vadd.f32 %v3597_v23, %v3639_v37  ;;  %v1580_v43 = vadd.f32 %v3738_v31, %v3736_v29 }
 0x168   : > { %2718 = vmatmul.mubr.msk.f32.gmra.mxu0 %vm1801_vm4, %v3793_v58  ;;  %v1698_v61 = vadd.f32 %v3597_v23, %v1585_v34  ;;  %v1763_v16 = vmax.f32 %v1699_v39, 0.0  ;;  %v1682_v8 = vadd.f32 %v3597_v23, %v3620_v48  ;;  %v1681_v29 = vadd.f32 %v3597_v23, %v3627_v21 }
 0x169   : > { %2726 = vmatpush3.xpose.msk.msra.mxu1 %vm1801_vm4, %v1755_v62  ;;  %2719 = vmatprep.mubr.msk.f32.mxu0 %vm1801_vm4, %v3809_v33  ;;  %v1747_v60 = vmax.f32 %v1683_v22, 0.0  ;;  %v1697_v12 = vadd.f32 %v3597_v23, %v1580_v43  ;;  %v1696_v31 = vadd.f32 %v3597_v23, %v3720_v3  ;;  %v1680_v48 = vadd.f32 %v3597_v23, %v3610_v30 }
 0x16a   : > { %2727 = vmatprep.subr.msk.mxu1 %vm1801_vm4, %v1770_v19  ;;  %v1762_v17 = vmax.f32 %v1698_v61, 0.0  ;;  %v1746_v37 = vmax.f32 %v1682_v8, 0.0  ;;  %v1745_v62 = vmax.f32 %v1681_v29, 0.0  ;;  %v1695_v19 = vadd.f32 %v3597_v23, %v3726_v59 }
 0x16b   : > { %v1761_v4 = vmax.f32 %v1697_v12, 0.0  ;;  %v1760_v18 = vmax.f32 %v1696_v31, 0.0  ;;  %v1744_v21 = vmax.f32 %v1680_v48, 0.0  ;;  %v1679_v3 = vadd.f32 %v3597_v23, %v3617_v47 }
 0x16c   : > { %2720 = vmatmul.mubr.msk.f32.gmra.mxu0 %vm1801_vm4, %v3809_v33  ;;  %v1694_v45 = vadd.f32 %v3597_v23, %v3709_v44  ;;  %v1759_v9 = vmax.f32 %v1695_v19, 0.0  ;;  %v1678_v30 = vadd.f32 %v3597_v23, %v3602_v51  ;;  %v1677_v44 = vadd.f32 %v3597_v23, %v3606_v14 }
 0x16d   : > { %2728 = vmatpush3.xpose.msk.msra.mxu1 %vm1801_vm4, %v1754_v24  ;;  %2721 = vmatprep.mubr.msk.f32.mxu0 %vm1801_vm4, %v3824_v52  ;;  %v1743_v59 = vmax.f32 %v1679_v3, 0.0  ;;  %v1757_v25 = vmax.f32 %v1693_v2, 0.0 }
 0x16e   : > { %2729 = vmatprep.subr.msk.mxu1 %vm1801_vm4, %v1769_v38  ;;  %v1758_v24 = vmax.f32 %v1694_v45, 0.0  ;;  %v1742_v47 = vmax.f32 %v1678_v30, 0.0  ;;  %v1741_v49 = vmax.f32 %v1677_v44, 0.0 }
 0x170   : > { %2722 = vmatmul.mubr.msk.f32.gmra.mxu0 %vm1801_vm4, %v3824_v52 }
 0x171   : > { %2730 = vmatpush3.xpose.msk.msra.mxu1 %vm1801_vm4, %v1753_v53 }
 0x172   : > { %2731 = vmatprep.subr.msk.mxu1 %vm1801_vm4, %v1768_v13 }
 0x175   : > { %2732 = vmatpush3.xpose.msk.msra.mxu1 %vm1801_vm4, %v1752_v7 }
 0x176   : > { %2733 = vmatprep.subr.msk.mxu1 %vm1801_vm4, %v1767_v20 }
 0x179   : > { %2734 = vmatpush3.xpose.msk.msra.mxu1 %vm1801_vm4, %v1751_v41 }
 0x17a   : > { %2735 = vmatprep.subr.msk.mxu1 %vm1801_vm4, %v1766_v26 }
 0x17d   : > { %2736 = vmatpush3.xpose.msk.msra.mxu1 %vm1801_vm4, %v1750_v56 }
 0x17e   : > { %2737 = vmatprep.subr.msk.mxu1 %vm1801_vm4, %v1765_v46 }
 0x181   : > { %2738 = vmatpush3.xpose.msk.msra.mxu1 %vm1801_vm4, %v1749_v0 }
 0x182   : > { %2739 = vmatprep.subr.msk.mxu1 %vm1801_vm4, %v1764_v35 }
 0x185   : > { %2740 = vmatpush3.xpose.msk.msra.mxu1 %vm1801_vm4, %v1748_v27 }
 0x186   : > { %2741 = vmatprep.subr.msk.mxu1 %vm1801_vm4, %v1763_v16 }
 0x189   : > { %2742 = vmatpush3.xpose.msk.msra.mxu1 %vm1801_vm4, %v1747_v60 }
 0x18a   : > { %2743 = vmatprep.subr.msk.mxu1 %vm1801_vm4, %v1762_v17 }
 0x18d   : > { %2744 = vmatpush3.xpose.msk.msra.mxu1 %vm1801_vm4, %v1746_v37 }
 0x18e   : > { %2745 = vmatprep.subr.msk.mxu1 %vm1801_vm4, %v1761_v4 }
 0x191   : > { %2746 = vmatpush3.xpose.msk.msra.mxu1 %vm1801_vm4, %v1745_v62 }
 0x192   : > { %2747 = vmatprep.subr.msk.mxu1 %vm1801_vm4, %v1760_v18 }
 0x195   : > { %2748 = vmatpush3.xpose.msk.msra.mxu1 %vm1801_vm4, %v1744_v21 }
 0x196   : > { %2749 = vmatprep.subr.msk.mxu1 %vm1801_vm4, %v1759_v9 }
 0x199   : > { %2750 = vmatpush3.xpose.msk.msra.mxu1 %vm1801_vm4, %v1743_v59 }
 0x19a   : > { %2751 = vmatprep.subr.msk.mxu1 %vm1801_vm4, %v1758_v24 }
 0x19d   : > { %2752 = vmatpush3.xpose.msk.msra.mxu1 %vm1801_vm4, %v1742_v47 }
 0x19e   : > { %2753 = vmatprep.subr.msk.mxu1 %vm1801_vm4, %v1757_v25 }
 0x1a1   : > { %2754 = vmatpush3.xpose.msk.msra.mxu1 %vm1801_vm4, %v1741_v49 }
 0x1a4   : > { %2756 = vmatmul.mubr.msk.f32.vlgmr.msra.gmra.mxu1 %vm1801_vm4, %v3588_v11  ;;  %v1784_v23 = vpop.permute.xlu0 %1783 }
 0x1a5   : > { %2757 = vmatprep.mubr.msk.f32.mxu1 %vm1801_vm4, %v3793_v58  ;;  %v1794_v50 = vpop.permute.xlu1 %1793 }
 0x1a8   : > { %2758 = vmatmul.mubr.msk.f32.gmra.mxu1 %vm1801_vm4, %v3793_v58  ;;  %v1789_v10 = vpop.permute.xlu0 %1788 }
 0x1a9   : > { %2759 = vmatprep.mubr.msk.f32.mxu1 %vm1801_vm4, %v3809_v33  ;;  %v1799_v7 = vpop.permute.xlu1 %1798 }
 0x1ac   : > { %2760 = vmatmul.mubr.msk.f32.gmra.mxu1 %vm1801_vm4, %v3809_v33 }
 0x1ad   : > { %2761 = vmatprep.mubr.msk.f32.mxu1 %vm1801_vm4, %v3824_v52 }
 0x1b0   : > { %2762 = vmatmul.mubr.msk.f32.gmra.mxu1 %vm1801_vm4, %v3824_v52 }
 0x224   : > { %v2072_v11 = vpop.f32.mrf.mxu0 }
 0x225   : > { %v2073_v38 = vadd.f32 %v2072_v11, %v1784_v23 }
 0x226   : > { %v2074_v51 = vpop.f32.mrf.mxu0 }
 0x227   : > { %v2075_v6 = vadd.f32 %v2074_v51, %v1784_v23  ;;  %v2184_v33 = vmax.f32 %v2073_v38, 0.0 }
 0x228   : > { %v2078_v14 = vpop.f32.mrf.mxu0 }
 0x229   : > { %v2079_v13 = vadd.f32 %v2078_v14, %v1789_v10  ;;  %v2185_v15 = vmax.f32 %v2075_v6, 0.0 }
 0x22a   : > { %v2080_v58 = vpop.f32.mrf.mxu0 }
 0x22b   : > { %v2081_v54 = vadd.f32 %v2080_v58, %v1789_v10  ;;  %v2188_v26 = vmax.f32 %v2079_v13, 0.0 }
 0x22c   : > { %v2084_v53 = vpop.f32.mrf.mxu0 }
 0x22d   : > { %v2085_v32 = vadd.f32 %v2084_v53, %v1794_v50  ;;  %v2189_v28 = vmax.f32 %v2081_v54, 0.0 }
 0x22e   : > { %v2086_v5 = vpop.f32.mrf.mxu0 }
 0x22f   : > { %v2192_v55 = vmax.f32 %v2085_v32, 0.0  ;;  %v2087_v52 = vadd.f32 %v2086_v5, %v1794_v50 }
 0x230   : > { %v2090_v20 = vpop.f32.mrf.mxu0 }
 0x231   : > { %v2200_v40 = vadd.f32 %v2192_v55, %v2184_v33  ;;  %v2193_v41 = vmax.f32 %v2087_v52, 0.0  ;;  %v2091_v36 = vadd.f32 %v2090_v20, %v1799_v7 }
 0x232   : > { %v2092_v42 = vpop.f32.mrf.mxu0 }
 0x233   : > { %2208 = vst [vmem:[%s3931_s22] sm:$0xff] %v2200_v40  ;;  %v2201_v56 = vadd.f32 %v2193_v41, %v2185_v15  ;;  %v2196_v57 = vmax.f32 %v2091_v36, 0.0  ;;  %v2093_v1 = vadd.f32 %v2092_v42, %v1799_v7 }
 0x235   : > { %2209 = vst [vmem:[%s3931_s22 + $0x8] sm:$0xff] %v2201_v56  ;;  %v2204_v46 = vadd.f32 %v2196_v57, %v2188_v26  ;;  %v2197_v63 = vmax.f32 %v2093_v1, 0.0 }
 0x237   : > { %2212 = vst [vmem:[%s3931_s22 + $0x20] sm:$0xff] %v2204_v46  ;;  %v2205_v0 = vadd.f32 %v2197_v63, %v2189_v28 }
 0x239   : > { %2213 = vst [vmem:[%s3931_s22 + $0x28] sm:$0xff] %v2205_v0 }
 0x264   : > { %v2161_v34 = vpop.f32.mrf.mxu1 }
 0x265   : > { %v2162_v22 = vadd.f32 %v2161_v34, %v1784_v23 }
 0x266   : > { %v2163_v35 = vpop.f32.mrf.mxu1 }
 0x267   : > { %v2164_v43 = vadd.f32 %v2163_v35, %v1784_v23  ;;  %v2186_v17 = vmax.f32 %v2162_v22, 0.0 }
 0x268   : > { %v2167_v39 = vpop.f32.mrf.mxu1 }
 0x269   : > { %v2168_v37 = vadd.f32 %v2167_v39, %v1789_v10  ;;  %v2187_v29 = vmax.f32 %v2164_v43, 0.0 }
 0x26a   : > { %v2169_v27 = vpop.f32.mrf.mxu1 }
 0x26b   : > { %v2170_v18 = vadd.f32 %v2169_v27, %v1789_v10  ;;  %v2190_v45 = vmax.f32 %v2168_v37, 0.0 }
 0x26c   : > { %v2173_v61 = vpop.f32.mrf.mxu1 }
 0x26d   : > { %v2174_v16 = vadd.f32 %v2173_v61, %v1794_v50  ;;  %v2191_v30 = vmax.f32 %v2170_v18, 0.0 }
 0x26e   : > { %v2175_v8 = vpop.f32.mrf.mxu1 }
 0x26f   : > { %v2194_v60 = vmax.f32 %v2174_v16, 0.0  ;;  %v2176_v12 = vadd.f32 %v2175_v8, %v1794_v50 }
 0x270   : > { %v2179_v31 = vpop.f32.mrf.mxu1 }
 0x271   : > { %v2202_v4 = vadd.f32 %v2194_v60, %v2186_v17  ;;  %v2195_v48 = vmax.f32 %v2176_v12, 0.0  ;;  %v2180_v62 = vadd.f32 %v2179_v31, %v1799_v7 }
 0x272   : > { %v2181_v19 = vpop.f32.mrf.mxu1 }
 0x273   : > { %2210 = vst [vmem:[%s3931_s22 + $0x10] sm:$0xff] %v2202_v4  ;;  %v2203_v21 = vadd.f32 %v2195_v48, %v2187_v29  ;;  %v2198_v3 = vmax.f32 %v2180_v62, 0.0  ;;  %v2182_v9 = vadd.f32 %v2181_v19, %v1799_v7 }
 0x275   : > { %2211 = vst [vmem:[%s3931_s22 + $0x18] sm:$0xff] %v2203_v21  ;;  %v2206_v59 = vadd.f32 %v2198_v3, %v2190_v45  ;;  %v2199_v24 = vmax.f32 %v2182_v9, 0.0 }
 0x277   : > { %2214 = vst [vmem:[%s3931_s22 + $0x30] sm:$0xff] %v2206_v59  ;;  %v2207_v2 = vadd.f32 %v2199_v24, %v2191_v30 }
 0x279   : > { %2215 = vst [vmem:[%s3931_s22 + $0x38] sm:$0xff] %v2207_v2 }
 0x27a   : > { %3049 = shalt.err (!%p3046_p7)
}
 0x27b   : > { %s3050_s20 = scalar_lea.hbm %s3945_s16, 1024  ;;  %s3054_s27 = scalar_lea.hbm %s4011_s7, 4096 }
 0x27c   : > { %p3051_p9 = scmp.ne.s32.totalorder %s3945_s16, %s3050_s20  ;;  %p3055_p12 = scmp.lt.s32.totalorder %s3945_s16, %s4011_s7 }
 0x27d   : > { %p3056_p13 = scmp.lt.s32.totalorder %s3054_s27, %s3050_s20 }
 0x27e   : > { %p3052_p10 = pnand %p3051_p9, %p3226_p3 }
 0x27f   : > { %p3057_p0 = por %p3056_p13, %p3055_p12 }
 0x280   : > { %p3053_p11 = pneg %p3052_p10 }
 0x282   : > { %p3058_p1 = pnand %p3057_p0, %p3053_p11 }
 0x284   : > { %3061 = shalt.err (!%p3058_p1)
}
 0x285   : > { %s3132_s18 = smov 512   ;;  %s3133_s21 = smov 1024  }
 0x286   : > { %s3134_s23 = smov 32  }
 0x287   : > { %2959 = dma.vmem_to_hbm [thread:$0]  (%p3226_p3), %s3947_s28, 1024, %s3945_s16, %s3953_s17, %s3132_s18, %s3133_s21, %s3134_s23  }
 0x288 PF: > { %p2965_p2 = scmp.ge.s32.totalorder %s3128_s8, 2  ;;  %s2247_s2 = sand.u32 1, %s3100_s24  }
 0x289   : > { %s2248_s20 = scalar_lea.sflag [#allocation3], %s2247_s2 }
 0x28a   : > { %p2962_p4 = pnand %p2965_p2, %p3235_p8 }
 0x28c   : > { %p2963_p5 = pneg %p2962_p4 }
 0x28e   : > { %3095 = dma.done.wait (%p2963_p5), %s2248_s20, 1024  }
 0x28f   : > { %3097 = vsyncadd (%p2963_p5), %s2248_s20, 4294966272  ;;  %s20_s8 = sadd.s32 1, %s3128_s8   ;;  %s4016_s24 = smov %s3104_s25 }
 0x290   : > { %p17_p6 = scmp.ge.s32.totalorder %s20_s8, 6   ;;  %s4017_s25 = smov %s3108_s26 }
 0x291   : > { %s4018_s26 = smov %s3244_s19  ;;  %s4019_s27 = smov %s3120_s29 }
 0x292   : > { %s4020_s28 = smov %s3124_s30  ;;  %s4021_s29 = smov %s4024_s11 }
 0x293   : > { %s4022_s30 = smov %s4028_s12  ;;  %19 = sbr.rel (!%p17_p6) target bundleno = 7 (0x7), region = 86 }
 0x298   :  { %2253 = vsyncpa [#allocation3], 1 }
 0x299   :  { %2255 = vsyncpa [#allocation3 + $0x1], 1 }

</bundles_post_ra>
